<compile_context>
chip_gen: v7x
topology: tpu7x:2x2x1
jax: 0.10.0
libtpu: 0.0.40
codegen_flags: <defaults>
</compile_context>

<pallas_src>
import functools

import jax
import jax.numpy as jnp
from jax.experimental import pallas as pl
from jax.experimental.pallas import tpu as pltpu

EPS = 1e-6


def _round_up(v, m):
    return -(-v // m) * m


def _vmem_limit_bytes():
    cap = 128 * 1024 * 1024
    try:
        info = pltpu.get_tpu_info()
        cap = int(getattr(info, "vmem_capacity_bytes", cap))
    except Exception:
        pass
    # ~40% of physical VMEM per kernel: ~51 MiB on 128 MiB chips (v5e/v6e),
    # ~25 MiB on 64 MiB chips (v7x) -- leaves headroom for double-buffering.
    return max(24 * 1024 * 1024, min(cap * 2 // 5, 64 * 1024 * 1024))


_VMEM_LIMIT = _vmem_limit_bytes()
_PAR1_CP = pltpu.CompilerParams(dimension_semantics=("parallel",),
                                vmem_limit_bytes=_VMEM_LIMIT)

_ROW_TILE = 512            # rows per step for the 1x1-conv style matmuls


# --------------------------------------------------------------------------
# in-kernel math helpers
# --------------------------------------------------------------------------
def _ln(x, w, b):
    mu = jnp.mean(x, axis=-1, keepdims=True)
    var = jnp.mean((x - mu) ** 2, axis=-1, keepdims=True)
    return (x - mu) * jax.lax.rsqrt(var + EPS) * w + b


def _dot(a, w_ref):
    w = w_ref[...]
    if a.shape[-1] == 1:
        # K == 1 (stem conv): plain broadcast multiply, avoid degenerate matmul.
        return (a * w).astype(jnp.float32)
    return jnp.dot(a.astype(w.dtype), w, preferred_element_type=jnp.float32)


# --------------------------------------------------------------------------
# small fused row kernels (row-tiled matmuls)
# --------------------------------------------------------------------------
def _mm_kernel(x_ref, w_ref, b_ref, o_ref):
    o_ref[...] = _dot(x_ref[...], w_ref) + b_ref[...]


def _mm_ln_kernel(x_ref, w_ref, b_ref, lw_ref, lb_ref, o_ref):
    o_ref[...] = _ln(_dot(x_ref[...], w_ref) + b_ref[...],
                     lw_ref[...], lb_ref[...])


def _ln_mm_kernel(x_ref, lw_ref, lb_ref, w_ref, b_ref, o_ref):
    o_ref[...] = _dot(_ln(x_ref[...], lw_ref[...], lb_ref[...]), w_ref) + b_ref[...]


# --------------------------------------------------------------------------
# fused ConvNeXt Block kernels (one grid step == one (n, d) depth slice)
# --------------------------------------------------------------------------
def _block_core(H, W, Mpad, x_ref, ww_ref, xpad_ref, dww_ref, dwb_ref,
                lw_ref, lb_ref, w1_ref, b1_ref, w2_ref, b2_ref, g_ref,
                dlw_ref, dlb_ref):
    """dwconv(1,7,7) + LN + MLP(GELU) + gamma*residual + down_layer LN.

    x_ref  : (M, C) rows of ONE depth slice (M = H*W, channels-last).
    xpad_ref: (Mpad, C) VMEM scratch.  Rows [0,P) and [P+M,Mpad) are zeroed,
              rows [P,P+M) hold x -> every kh (row) tap reads genuine zeros at
              the H edges, so no h-mask is needed; only the 6 kw columns with
              dw != 0 need ONE select each (hoisted out of the 7x7 tap loop).
    """
    M = H * W
    P = 3 * W + 3
    C = x_ref.shape[-1]
    x = x_ref[...]

    # Build the zero-halo row buffer in VMEM (no HBM pad copy in the wrapper).
    xpad_ref[pl.ds(0, P), :] = jnp.zeros((P, C), jnp.float32)
    xpad_ref[pl.ds(P, M), :] = x
    tail = Mpad - P - M
    xpad_ref[pl.ds(P + M, tail), :] = jnp.zeros((tail, C), jnp.float32)

    ww = ww_ref[...]                                   # (M, 1) int32 w index
    acc = jnp.zeros((M, C), jnp.float32)
    for kw in range(7):
        dwd = kw - 3
        if abs(dwd) >= W:
            continue
        part = None
        for kh in range(7):
            dh = kh - 3
            if abs(dh) >= H:
                continue                               # tap reads only zeros
            off = dh * W + dwd
            tap = x if off == 0 else xpad_ref[pl.ds(P + off, M), :]
            t = tap * dww_ref[pl.ds(kh * 7 + kw, 1), :]
            part = t if part is None else part + t
        if part is None:
            continue
        if dwd == 0:
            acc = acc + part
        else:
            valid = jnp.logical_and(ww + dwd >= 0, ww + dwd < W)
            acc = acc + jnp.where(valid, part, 0.0)    # 1 select per kw column

    y = acc + dwb_ref[...]
    xn = _ln(y, lw_ref[...], lb_ref[...])
    # tanh-approx GELU -> EUP slot (slight deviation from PyTorch's exact erf).
    h = jax.nn.gelu(_dot(xn, w1_ref) + b1_ref[...], approximate=True)
    z = _dot(h, w2_ref) + b2_ref[...]
    r = x + g_ref[...] * z                             # residual (DropPath=id)
    return _ln(r, dlw_ref[...], dlb_ref[...])          # down_layer LayerNorm


def _block_kernel(H, W, Mpad, x_ref, ww_ref, dww_ref, dwb_ref, lw_ref, lb_ref,
                  w1_ref, b1_ref, w2_ref, b2_ref, g_ref, dlw_ref, dlb_ref,
                  dcw_ref, dcb_ref, o_ref, xpad_ref):
    rn = _block_core(H, W, Mpad, x_ref, ww_ref, xpad_ref, dww_ref, dwb_ref,
                     lw_ref, lb_ref, w1_ref, b1_ref, w2_ref, b2_ref, g_ref,
                     dlw_ref, dlb_ref)
    o_ref[...] = _dot(rn, dcw_ref) + dcb_ref[...]      # 1x1x1 conv


def _block_down_kernel(H, W, Mpad, x_ref, ww_ref, dww_ref, dwb_ref, lw_ref,
                       lb_ref, w1_ref, b1_ref, w2_ref, b2_ref, g_ref,
                       dlw_ref, dlb_ref, o_ref, xpad_ref):
    o_ref[...] = _block_core(H, W, Mpad, x_ref, ww_ref, xpad_ref, dww_ref,
                             dwb_ref, lw_ref, lb_ref, w1_ref, b1_ref, w2_ref,
                             b2_ref, g_ref, dlw_ref, dlb_ref)


def _block_final_kernel(H, W, Mpad, x_ref, ww_ref, dww_ref, dwb_ref, lw_ref,
                        lb_ref, w1_ref, b1_ref, w2_ref, b2_ref, g_ref,
                        dlw_ref, dlb_ref, dcw_ref, dcb_ref, ow_ref, ob_ref,
                        o_ref, xpad_ref):
    rn = _block_core(H, W, Mpad, x_ref, ww_ref, xpad_ref, dww_ref, dwb_ref,
                     lw_ref, lb_ref, w1_ref, b1_ref, w2_ref, b2_ref, g_ref,
                     dlw_ref, dlb_ref)
    u = _dot(rn, dcw_ref) + dcb_ref[...]               # final 1x1 conv
    zlog = _dot(u, ow_ref) + ob_ref[...]               # Outlayer 1x1 conv
    zlog = zlog - jnp.max(zlog, axis=-1, keepdims=True)
    e = jnp.exp(zlog)                                  # Softmax(dim=channels)
    o_ref[...] = e * pl.reciprocal(jnp.sum(e, axis=-1, keepdims=True),
                                   approx=True)


# --------------------------------------------------------------------------
# pallas_call glue
# --------------------------------------------------------------------------
def _zero_idx(nd, *_):
    return (0,) * nd


def _full_spec(a):
    return pl.BlockSpec(a.shape, functools.partial(_zero_idx, a.ndim))


def _row_call(kernel, x2d, cout, *weights):
    """Row-tiled call for the 1x1-conv style matmul kernels."""
    rows, k = x2d.shape
    tm = _ROW_TILE if rows > _ROW_TILE else rows
    in_specs = [pl.BlockSpec((tm, k), lambda i: (i, 0))]
    in_specs += [_full_spec(w) for w in weights]
    return pl.pallas_call(
        kernel,
        out_shape=jax.ShapeDtypeStruct((rows, cout), jnp.float32),
        grid=(pl.cdiv(rows, tm),),
        in_specs=in_specs,
        out_specs=pl.BlockSpec((tm, cout), lambda i: (i, 0)),
        compiler_params=_PAR1_CP,
    )(x2d, *weights)


def block_apply(x, p, final_head=None):
    """Fused ConvNeXt Block.  x: (N, D, H, W, C) channels-last f32."""
    N, D, H, W, C = x.shape
    M = H * W
    P = 3 * W + 3
    Mpad = _round_up(M + 2 * P, 8)
    ND = N * D
    x2 = x.reshape(ND, M, C)
    ww = (jnp.arange(M, dtype=jnp.int32) % W).reshape(M, 1)   # w index per row

    weights = [p["dw_w"], p["dw_b"], p["ln_w"], p["ln_b"],
               p["w1"], p["b1"], p["w2"], p["b2"], p["gamma"],
               p["dln_w"], p["dln_b"]]
    if p["down"]:
        kern = functools.partial(_block_down_kernel, H, W, Mpad)
        Cout = C
    elif final_head is not None:
        kern = functools.partial(_block_final_kernel, H, W, Mpad)
        weights += [p["dconv_w"], p["dconv_b"], final_head[0], final_head[1]]
        Cout = final_head[1].shape[-1]
    else:
        kern = functools.partial(_block_kernel, H, W, Mpad)
        weights += [p["dconv_w"], p["dconv_b"]]
        Cout = p["dconv_b"].shape[-1]

    in_specs = [pl.BlockSpec((None, M, C), lambda i: (i, 0, 0)),
                pl.BlockSpec((M, 1), lambda i: (0, 0))]
    in_specs += [_full_spec(wa) for wa in weights]

    out = pl.pallas_call(
        kern,
        out_shape=jax.ShapeDtypeStruct((ND, M, Cout), jnp.float32),
        grid=(ND,),
        in_specs=in_specs,
        out_specs=pl.BlockSpec((None, M, Cout), lambda i: (i, 0, 0)),
        scratch_shapes=[pltpu.VMEM((Mpad, C), jnp.float32)],
        compiler_params=_PAR1_CP,
    )(x2, ww, *weights)

    if not p["down"]:
        return out.reshape(N, D, H, W, Cout)

    # down_layer tail: LayerNorm already applied in-kernel.  Strided conv
    # kernel=(3,2,2) stride=(1,2,2) via host im2col + a row-tiled matmul.
    # TODO(synk): move the stride-2 window gather in-kernel (PrefetchScalarGridSpec).
    zn = out.reshape(N, D, H, W, C)
    Dout, Ho, Wo = D - 2, H // 2, W // 2
    cols = jnp.stack([zn[:, kd:kd + Dout] for kd in range(3)], axis=-2)
    cols = cols.reshape(N, Dout, Ho, 2, Wo, 2, 3, C)
    cols = jnp.transpose(cols, (0, 1, 2, 4, 6, 3, 5, 7)).reshape(-1, 12 * C)
    CoutD = p["dconv_b"].shape[-1]
    o2 = _row_call(_mm_kernel, cols, CoutD, p["dconv_w"], p["dconv_b"])
    return o2.reshape(N, Dout, Ho, Wo, CoutD)


def up_apply(x, p):
    """LayerNorm(channels_first) + ConvTranspose3d k=(1,2,2) s=(1,2,2)."""
    N, D, H, W, C = x.shape
    C4 = p["w"].shape[1]
    Cout = C4 // 4
    y2 = _row_call(_ln_mm_kernel, x.reshape(-1, C), C4,
                   p["ln_w"], p["ln_b"], p["w"], p["b4"])
    y = y2.reshape(N, D, H, W, 2, 2, Cout)
    y = jnp.transpose(y, (0, 1, 2, 4, 3, 5, 6)).reshape(N, D, 2 * H, 2 * W, Cout)
    return y


def unext_forward(x, params):
    """x: (N, C_in, D, H, W)  ->  (N, classes, D, H, W)."""
    x = jnp.transpose(x, (0, 2, 3, 4, 1)).astype(jnp.float32)   # -> NDHWC
    N, D, H, W, Cin = x.shape
    C0 = params["stem_w"].shape[1]

    # stem: 1x1x1 conv + channels_first LayerNorm, fused, row-tiled.
    y = _row_call(_mm_ln_kernel, x.reshape(-1, Cin), C0,
                  params["stem_w"], params["stem_b"],
                  params["stem_ln_w"], params["stem_ln_b"])
    x = y.reshape(N, D, H, W, C0)

    shortcuts = []
    for stage in params["down_stages"]:
        shortcuts.append(x)
        for blk in stage:
            x = block_apply(x, blk)

    # TODO(synk): skip-connection concat + D pad still materialize in HBM.
    for idx, stage in enumerate(params["up_stages"]):
        x = up_apply(x, params["ups"][idx])
        x = jnp.pad(x, ((0, 0), (1, 1), (0, 0), (0, 0), (0, 0)))  # F.pad D by (1,1)
        x = jnp.concatenate([x, shortcuts[-1 - idx]], axis=-1)
        for blk in stage:
            x = block_apply(x, blk)

    x = up_apply(x, params["ups"][-1])
    x = jnp.pad(x, ((0, 0), (1, 1), (0, 0), (0, 0), (0, 0)))
    x = jnp.concatenate([x, shortcuts[0]], axis=-1)
    out = block_apply(x, params["final"],
                      final_head=(params["out_w"], params["out_b"]))
    return jnp.transpose(out, (0, 4, 1, 2, 3))                  # back to NCDHW


# --------------------------------------------------------------------------
# Deterministic parameter initialization (shapes follow UNext.__init__)
# --------------------------------------------------------------------------
class KeyGen:
    def __init__(self, key):
        self.key = key
        self.i = 0

    def __call__(self):
        self.i += 1
        return jax.random.fold_in(self.key, self.i)


def _w(kg, shape, std=0.02, dtype=jnp.float32):
    return (std * jax.random.normal(kg(), shape, jnp.float32)).astype(dtype)


def init_block(kg, dim, out_dim, down, lsiv=1e-6):
    p = dict(
        dw_w=_w(kg, (49, dim)),                        # depthwise taps (kh*7+kw, c)
        dw_b=jnp.zeros((1, dim), jnp.float32),
        ln_w=jnp.ones((1, dim), jnp.float32),
        ln_b=jnp.zeros((1, dim), jnp.float32),
        w1=_w(kg, (dim, 4 * dim), dtype=jnp.bfloat16),
        b1=jnp.zeros((1, 4 * dim), jnp.float32),
        w2=_w(kg, (4 * dim, dim), dtype=jnp.bfloat16),
        b2=jnp.zeros((1, dim), jnp.float32),
        gamma=lsiv * jnp.ones((1, dim), jnp.float32),
        dln_w=jnp.ones((1, dim), jnp.float32),
        dln_b=jnp.zeros((1, dim), jnp.float32),
        down=down,
    )
    if down:
        p["dconv_w"] = _w(kg, (12 * dim, out_dim), dtype=jnp.bfloat16)  # im2col (kd,kh,kw,ci)
    else:
        p["dconv_w"] = _w(kg, (dim, out_dim), dtype=jnp.bfloat16)       # 1x1x1 conv
    p["dconv_b"] = jnp.zeros((1, out_dim), jnp.float32)
    return p


def init_unext(key, in_channels, out_channels, layer_sizes, depths, lsiv=1e-6):
    kg = KeyGen(key)
    params = dict(
        stem_w=_w(kg, (in_channels, depths[0])),
        stem_b=jnp.zeros((1, depths[0]), jnp.float32),
        stem_ln_w=jnp.ones((1, depths[0]), jnp.float32),
        stem_ln_b=jnp.zeros((1, depths[0]), jnp.float32),
    )
    down_stages = []
    for idx in range(len(depths) - 1):
        blocks = []
        for i in range(layer_sizes[idx]):
            last = i == layer_sizes[idx] - 1
            blocks.append(init_block(kg, depths[idx],
                                     depths[idx + 1] if last else depths[idx],
                                     down=last, lsiv=lsiv))
        down_stages.append(blocks)
    params["down_stages"] = down_stages

    up_stages = []
    for idx in range(len(depths) - 1, 1, -1):
        blocks = []
        n = layer_sizes[idx - 1]
        for i in range(n):
            last = i == n - 1
            blocks.append(init_block(kg, depths[idx],
                                     depths[idx - 1] if last else depths[idx],
                                     down=False, lsiv=lsiv))
        up_stages.append(blocks)
    params["up_stages"] = up_stages

    ups = []
    for idx in range(len(depths) - 1, 0, -1):
        ups.append(dict(
            ln_w=jnp.ones((1, depths[idx]), jnp.float32),
            ln_b=jnp.zeros((1, depths[idx]), jnp.float32),
            # ConvTranspose (1,2,2): columns ordered (i, j, c_out); bias pre-tiled.
            w=_w(kg, (depths[idx], 4 * depths[idx - 1]), dtype=jnp.bfloat16),
            b4=jnp.zeros((1, 4 * depths[idx - 1]), jnp.float32),
        ))
    params["ups"] = ups

    params["final"] = init_block(kg, depths[1], depths[0], down=False, lsiv=lsiv)
    params["out_w"] = _w(kg, (depths[0], out_channels))
    params["out_b"] = jnp.zeros((1, out_channels), jnp.float32)
    return params


# --------------------------------------------------------------------------
if __name__ == "__main__":
    # Small config consistent with the module's constructor signature.
    N, Cin, D, H, W = 1, 1, 10, 16, 16
    out_channels = 2
    layer_sizes = [1, 1, 1, 1]
    depths = [8, 16, 32, 64, 128]

    params = init_unext(jax.random.PRNGKey(1), Cin, out_channels,
                        layer_sizes, depths)
    x = jax.random.normal(jax.random.PRNGKey(0), (N, Cin, D, H, W), jnp.float32)

    out = unext_forward(x, params)
    out = jax.block_until_ready(out)

    assert out.shape == (N, out_channels, D, H, W), out.shape
    # Softmax over channel dim must sum to ~1 (approx reciprocal) and be finite.
    sums = jnp.sum(out, axis=1)
    assert bool(jnp.all(jnp.isfinite(out)))
    assert bool(jnp.allclose(sums, 1.0, atol=2e-2))
    print("KERNEL_OK")
</pallas_src>

<mosaic_0001>
module attributes {stable_mosaic.version = 11 : i64} {
  func.func @_mm_ln_kernel(%arg0: i32, %arg1: memref<512x1xf32, #tpu.memory_space<vmem>>, %arg2: memref<1x8xf32, #tpu.memory_space<vmem>>, %arg3: memref<1x8xf32, #tpu.memory_space<vmem>>, %arg4: memref<1x8xf32, #tpu.memory_space<vmem>>, %arg5: memref<1x8xf32, #tpu.memory_space<vmem>>, %arg6: memref<512x8xf32, #tpu.memory_space<vmem>>) attributes {dimension_semantics = [#tpu.dimension_semantics<parallel>], iteration_bounds = array<i64: 5>, scalar_prefetch = 0 : i64, scratch_operands = 0 : i64, tpu.core_type = #tpu.core_type<tc>, window_params = [{transform_indices = @transform_0, window_bounds = array<i64: 512, 1>}, {pipeline_mode = #tpu.pipeline_mode<synchronous>, transform_indices = @transform_1, window_bounds = array<i64: 1, 8>}, {pipeline_mode = #tpu.pipeline_mode<synchronous>, transform_indices = @transform_2, window_bounds = array<i64: 1, 8>}, {pipeline_mode = #tpu.pipeline_mode<synchronous>, transform_indices = @transform_3, window_bounds = array<i64: 1, 8>}, {pipeline_mode = #tpu.pipeline_mode<synchronous>, transform_indices = @transform_4, window_bounds = array<i64: 1, 8>}, {transform_indices = @transform_5, window_bounds = array<i64: 512, 8>}]} {
    %c0 = arith.constant 0 : index
    %c0_0 = arith.constant 0 : index
    %0 = vector.load %arg1[%c0, %c0_0] : memref<512x1xf32, #tpu.memory_space<vmem>>, vector<512x1xf32>
    %c0_1 = arith.constant 0 : index
    %c0_2 = arith.constant 0 : index
    %1 = vector.load %arg2[%c0_1, %c0_2] : memref<1x8xf32, #tpu.memory_space<vmem>>, vector<1x8xf32>
    %2 = vector.broadcast %0 : vector<512x1xf32> to vector<512x8xf32>
    %3 = vector.broadcast %1 : vector<1x8xf32> to vector<512x8xf32>
    %4 = arith.mulf %2, %3 : vector<512x8xf32>
    %c0_3 = arith.constant 0 : index
    %c0_4 = arith.constant 0 : index
    %5 = vector.load %arg3[%c0_3, %c0_4] : memref<1x8xf32, #tpu.memory_space<vmem>>, vector<1x8xf32>
    %6 = vector.broadcast %5 : vector<1x8xf32> to vector<512x8xf32>
    %7 = arith.addf %4, %6 : vector<512x8xf32>
    %c0_5 = arith.constant 0 : index
    %c0_6 = arith.constant 0 : index
    %8 = vector.load %arg4[%c0_5, %c0_6] : memref<1x8xf32, #tpu.memory_space<vmem>>, vector<1x8xf32>
    %c0_7 = arith.constant 0 : index
    %c0_8 = arith.constant 0 : index
    %9 = vector.load %arg5[%c0_7, %c0_8] : memref<1x8xf32, #tpu.memory_space<vmem>>, vector<1x8xf32>
    %cst = arith.constant dense<0.000000e+00> : vector<512xf32>
    %10 = vector.multi_reduction <add>, %7, %cst [1] : vector<512x8xf32> to vector<512xf32>
    %11 = vector.shape_cast %10 : vector<512xf32> to vector<512x1xf32>
    %cst_9 = arith.constant 8.000000e+00 : f32
    %12 = vector.broadcast %cst_9 : f32 to vector<512x1xf32>
    %13 = arith.divf %11, %12 : vector<512x1xf32>
    %14 = vector.broadcast %13 : vector<512x1xf32> to vector<512x8xf32>
    %15 = arith.subf %7, %14 : vector<512x8xf32>
    %16 = arith.mulf %15, %15 : vector<512x8xf32>
    %cst_10 = arith.constant dense<0.000000e+00> : vector<512xf32>
    %17 = vector.multi_reduction <add>, %16, %cst_10 [1] : vector<512x8xf32> to vector<512xf32>
    %18 = vector.shape_cast %17 : vector<512xf32> to vector<512x1xf32>
    %cst_11 = arith.constant 8.000000e+00 : f32
    %19 = vector.broadcast %cst_11 : f32 to vector<512x1xf32>
    %20 = arith.divf %18, %19 : vector<512x1xf32>
    %21 = vector.broadcast %13 : vector<512x1xf32> to vector<512x8xf32>
    %22 = arith.subf %7, %21 : vector<512x8xf32>
    %cst_12 = arith.constant 9.99999997E-7 : f32
    %23 = vector.broadcast %cst_12 : f32 to vector<512x1xf32>
    %24 = arith.addf %20, %23 : vector<512x1xf32>
    %25 = math.rsqrt %24 : vector<512x1xf32>
    %26 = vector.broadcast %25 : vector<512x1xf32> to vector<512x8xf32>
    %27 = arith.mulf %22, %26 : vector<512x8xf32>
    %28 = vector.broadcast %8 : vector<1x8xf32> to vector<512x8xf32>
    %29 = arith.mulf %27, %28 : vector<512x8xf32>
    %30 = vector.broadcast %9 : vector<1x8xf32> to vector<512x8xf32>
    %31 = arith.addf %29, %30 : vector<512x8xf32>
    %c0_13 = arith.constant 0 : index
    %c0_14 = arith.constant 0 : index
    %32 = vector.load %arg6[%c0_13, %c0_14] : memref<512x8xf32, #tpu.memory_space<vmem>>, vector<512x8xf32>
    tpu.vector_store %arg6[%c0_13, %c0_14], %31 {strides = array<i32>} : memref<512x8xf32, #tpu.memory_space<vmem>>, vector<512x8xf32>,
    return
  }
  func.func @transform_0(%arg0: i32) -> (i32, i32) {
    %c0_i32 = arith.constant 0 : i32
    %c0_i32_0 = arith.constant 0 : i32
    return %arg0, %c0_i32 : i32, i32
  }
  func.func @transform_1(%arg0: i32) -> (i32, i32) {
    %c0_i32 = arith.constant 0 : i32
    %c0_i32_0 = arith.constant 0 : i32
    %c0_i32_1 = arith.constant 0 : i32
    return %c0_i32, %c0_i32_0 : i32, i32
  }
  func.func @transform_2(%arg0: i32) -> (i32, i32) {
    %c0_i32 = arith.constant 0 : i32
    %c0_i32_0 = arith.constant 0 : i32
    %c0_i32_1 = arith.constant 0 : i32
    return %c0_i32, %c0_i32_0 : i32, i32
  }
  func.func @transform_3(%arg0: i32) -> (i32, i32) {
    %c0_i32 = arith.constant 0 : i32
    %c0_i32_0 = arith.constant 0 : i32
    %c0_i32_1 = arith.constant 0 : i32
    return %c0_i32, %c0_i32_0 : i32, i32
  }
  func.func @transform_4(%arg0: i32) -> (i32, i32) {
    %c0_i32 = arith.constant 0 : i32
    %c0_i32_0 = arith.constant 0 : i32
    %c0_i32_1 = arith.constant 0 : i32
    return %c0_i32, %c0_i32_0 : i32, i32
  }
  func.func @transform_5(%arg0: i32) -> (i32, i32) {
    %c0_i32 = arith.constant 0 : i32
    %c0_i32_0 = arith.constant 0 : i32
    return %arg0, %c0_i32 : i32, i32
  }
}

</mosaic_0001>

<bundles_post_ra>
// kernel: tpu_custom_call.1
= control target key start
LH: loop header
LB: loop body
LE: loop exit
PB: predicated region body
PF: predicated region fallthrough
CT: control target
= control target key end

     0   :  { %s2045_s18 = smov 0   ;;  %s3234_s0 = inlined_call_operand.vmem [shape: f32[2560,1], index: 0, kind: input, shape index: {}]   ;;  %s3235_s1 = inlined_call_operand.vmem [shape: f32[1,8], index: 1, kind: input, shape index: {}]   ;;  %s3236_s2 = inlined_call_operand.vmem [shape: f32[1,8], index: 2, kind: input, shape index: {}]   ;;  %s3237_s3 = inlined_call_operand.vmem [shape: f32[1,8], index: 3, kind: input, shape index: {}]   ;;  %s3238_s4 = inlined_call_operand.vmem [shape: f32[1,8], index: 4, kind: input, shape index: {}]   ;;  %s3239_s5 = inlined_call_operand.vmem [shape: f32[2560,8], index: 5, kind: output, shape index: {}]  }
   0x1 LB: > { %s1850_s19 = sadd.s32 4294967295, %s2012_s18   ;;  %p1854_p0 = scmp.ge.s32.totalorder %s2012_s18, 1  ;;  %s2012_s18 = sphi %s2045_s18, %s15_s18  }
   0x2   : > { %p188_p1 = scmp.lt.s32.totalorder %s2012_s18, 6 }
   0x4   : > { %p189_p2 = pnand %p1854_p0, %p188_p1 }
   0x6   : > { %192 = sbr.rel (%p189_p2) target bundleno = 618 (0x26a), region = 40 }
   0xd   : > { %s1855_s20 = sshll.u32 %s1850_s19, 6  ;;  %v2014_v0 = vmov 0   ;;  %vm756_vm0 = vcmask 64512  }
   0xe   : > { %1875 = vset.pattern.permute.xlu1 %v2014_v0  ;;  %1874 = vset.pattern.permute.xlu0 %v2014_v0  ;;  %p217_p3 = scmp.lt.s32.totalorder %s1855_s20, 319 }
  0x10   : > { %s3334_s20 = smov (!%p217_p3, %s1855_s20), 319 }
  0x11   : > { %s1856_s21 = sshll.u32 %s3334_s20, 3 }
  0x12   : > { %s2061_s24 = scalar_lea.vmem %s3234_s0, %s1856_s21  ;;  %s2922_s10 = scalar_lea.vmem %s3239_s5, %s1856_s21 }
  0x13   : > { %v230_v1 = vld [vmem:[%s2061_s24 + $0x10] sm:$0xff]  ;;  %v228_v2 = vld [vmem:[%s2061_s24] sm:$0xff]  ;;  %v231_v3 = vld [vmem:[%s2061_s24 + $0x18] sm:$0xff] }
  0x14   : > { %305 = vperm.xlu1 %1875, %v230_v1   ;;  %295 = vperm.xlu0 %1874, %v228_v2   ;;  %v229_v4 = vld [vmem:[%s2061_s24 + $0x8] sm:$0xff]  ;;  %v232_v6 = vld [vmem:[%s2061_s24 + $0x20] sm:$0xff]  ;;  %v235_v7 = vld [vmem:[%s2061_s24 + $0x38] sm:$0xff] }
  0x15   : > { %v233_v5 = vld [vmem:[%s2061_s24 + $0x28] sm:$0xff]  ;;  %v234_v8 = vld [vmem:[%s2061_s24 + $0x30] sm:$0xff]  ;;  %v236_v10 = vld [vmem:[%s2061_s24 + $0x40] sm:$0xff] }
  0x16   : > { %v237_v9 = vld [vmem:[%s2061_s24 + $0x48] sm:$0xff]  ;;  %v239_v11 = vld [vmem:[%s2061_s24 + $0x58] sm:$0xff]  ;;  %v238_v12 = vld [vmem:[%s2061_s24 + $0x50] sm:$0xff] }
  0x17   : > { %v241_v13 = vld [vmem:[%s2061_s24 + $0x68] sm:$0xff]  ;;  %v240_v14 = vld [vmem:[%s2061_s24 + $0x60] sm:$0xff]  ;;  %v243_v15 = vld [vmem:[%s2061_s24 + $0x78] sm:$0xff] }
  0x18   : > { %310 = vperm.xlu1 %1875, %v231_v3   ;;  %300 = vperm.xlu0 %1874, %v229_v4   ;;  %v242_v16 = vld [vmem:[%s2061_s24 + $0x70] sm:$0xff]  ;;  %v245_v17 = vld [vmem:[%s2061_s24 + $0x88] sm:$0xff]  ;;  %v244_v18 = vld [vmem:[%s2061_s24 + $0x80] sm:$0xff] }
  0x19   : > { %v247_v19 = vld [vmem:[%s2061_s24 + $0x98] sm:$0xff]  ;;  %v246_v20 = vld [vmem:[%s2061_s24 + $0x90] sm:$0xff]  ;;  %v249_v21 = vld [vmem:[%s2061_s24 + $0xa8] sm:$0xff] }
  0x1a   : > { %v248_v22 = vld [vmem:[%s2061_s24 + $0xa0] sm:$0xff]  ;;  %v251_v23 = vld [vmem:[%s2061_s24 + $0xb8] sm:$0xff]  ;;  %v250_v24 = vld [vmem:[%s2061_s24 + $0xb0] sm:$0xff] }
  0x1b   : > { %v253_v25 = vld [vmem:[%s2061_s24 + $0xc8] sm:$0xff]  ;;  %v252_v26 = vld [vmem:[%s2061_s24 + $0xc0] sm:$0xff]  ;;  %v255_v27 = vld [vmem:[%s2061_s24 + $0xd8] sm:$0xff] }
  0x1c   : > { %320 = vperm.xlu1 %1875, %v233_v5   ;;  %315 = vperm.xlu0 %1874, %v232_v6   ;;  %v254_v28 = vld [vmem:[%s2061_s24 + $0xd0] sm:$0xff]  ;;  %v257_v29 = vld [vmem:[%s2061_s24 + $0xe8] sm:$0xff]  ;;  %v256_v30 = vld [vmem:[%s2061_s24 + $0xe0] sm:$0xff] }
  0x1d   : > { %v259_v31 = vld [vmem:[%s2061_s24 + $0xf8] sm:$0xff]  ;;  %v258_v32 = vld [vmem:[%s2061_s24 + $0xf0] sm:$0xff]  ;;  %v261_v33 = vld [vmem:[%s2061_s24 + $0x108] sm:$0xff] }
  0x1e   : > { %v260_v34 = vld [vmem:[%s2061_s24 + $0x100] sm:$0xff]  ;;  %v263_v35 = vld [vmem:[%s2061_s24 + $0x118] sm:$0xff]  ;;  %v262_v36 = vld [vmem:[%s2061_s24 + $0x110] sm:$0xff] }
  0x1f   : > { %v265_v37 = vld [vmem:[%s2061_s24 + $0x128] sm:$0xff]  ;;  %v264_v38 = vld [vmem:[%s2061_s24 + $0x120] sm:$0xff]  ;;  %v267_v39 = vld [vmem:[%s2061_s24 + $0x138] sm:$0xff] }
  0x20   : > { %330 = vperm.xlu1 %1875, %v235_v7   ;;  %325 = vperm.xlu0 %1874, %v234_v8   ;;  %v266_v40 = vld [vmem:[%s2061_s24 + $0x130] sm:$0xff]  ;;  %v269_v41 = vld [vmem:[%s2061_s24 + $0x148] sm:$0xff]  ;;  %v268_v42 = vld [vmem:[%s2061_s24 + $0x140] sm:$0xff] }
  0x21   : > { %v271_v43 = vld [vmem:[%s2061_s24 + $0x158] sm:$0xff]  ;;  %v270_v44 = vld [vmem:[%s2061_s24 + $0x150] sm:$0xff]  ;;  %v273_v45 = vld [vmem:[%s2061_s24 + $0x168] sm:$0xff] }
  0x22   : > { %v272_v46 = vld [vmem:[%s2061_s24 + $0x160] sm:$0xff]  ;;  %v275_v47 = vld [vmem:[%s2061_s24 + $0x178] sm:$0xff]  ;;  %v274_v48 = vld [vmem:[%s2061_s24 + $0x170] sm:$0xff] }
  0x23   : > { %v277_v49 = vld [vmem:[%s2061_s24 + $0x188] sm:$0xff]  ;;  %v276_v50 = vld [vmem:[%s2061_s24 + $0x180] sm:$0xff]  ;;  %v279_v51 = vld [vmem:[%s2061_s24 + $0x198] sm:$0xff] }
  0x24   : > { %340 = vperm.xlu1 %1875, %v237_v9   ;;  %335 = vperm.xlu0 %1874, %v236_v10   ;;  %v278_v52 = vld [vmem:[%s2061_s24 + $0x190] sm:$0xff]  ;;  %v281_v53 = vld [vmem:[%s2061_s24 + $0x1a8] sm:$0xff]  ;;  %v280_v54 = vld [vmem:[%s2061_s24 + $0x1a0] sm:$0xff] }
  0x25   : > { %v283_v55 = vld [vmem:[%s2061_s24 + $0x1b8] sm:$0xff]  ;;  %v282_v56 = vld [vmem:[%s2061_s24 + $0x1b0] sm:$0xff]  ;;  %v285_v57 = vld [vmem:[%s2061_s24 + $0x1c8] sm:$0xff] }
  0x26   : > { %v284_v58 = vld [vmem:[%s2061_s24 + $0x1c0] sm:$0xff]  ;;  %v287_v59 = vld [vmem:[%s2061_s24 + $0x1d8] sm:$0xff]  ;;  %v286_v60 = vld [vmem:[%s2061_s24 + $0x1d0] sm:$0xff] }
  0x27   : > { %v289_v61 = vld [vmem:[%s2061_s24 + $0x1e8] sm:$0xff]  ;;  %v288_v62 = vld [vmem:[%s2061_s24 + $0x1e0] sm:$0xff]  ;;  %v291_v63 = vld [vmem:[%s2061_s24 + $0x1f8] sm:$0xff] }
  0x28   : > { %350 = vperm.xlu1 %1875, %v239_v11   ;;  %345 = vperm.xlu0 %1874, %v238_v12   ;;  %v290_v0 = vld [vmem:[%s2061_s24 + $0x1f0] sm:$0xff]  ;;  %v2130_v9 = vld [vmem:[%s3235_s1] ss:$0 sm:$0xff] }
  0x2c   : > { %360 = vperm.xlu1 %1875, %v241_v13   ;;  %355 = vperm.xlu0 %1874, %v240_v14  }
  0x30   : > { %370 = vperm.xlu1 %1875, %v243_v15   ;;  %365 = vperm.xlu0 %1874, %v242_v16   ;;  %v2136_v15 = vld [vmem:[%s3236_s2] ss:$0 sm:$0xff] }
  0x34   : > { %380 = vperm.xlu1 %1875, %v245_v17   ;;  %375 = vperm.xlu0 %1874, %v244_v18  }
  0x38   : > { %390 = vperm.xlu1 %1875, %v247_v19   ;;  %385 = vperm.xlu0 %1874, %v246_v20  }
  0x3c   : > { %400 = vperm.xlu1 %1875, %v249_v21   ;;  %395 = vperm.xlu0 %1874, %v248_v22  }
  0x40   : > { %410 = vperm.xlu1 %1875, %v251_v23   ;;  %405 = vperm.xlu0 %1874, %v250_v24  }
  0x44   : > { %420 = vperm.xlu1 %1875, %v253_v25   ;;  %415 = vperm.xlu0 %1874, %v252_v26  }
  0x48   : > { %430 = vperm.xlu1 %1875, %v255_v27   ;;  %425 = vperm.xlu0 %1874, %v254_v28  }
  0x4c   : > { %440 = vperm.xlu1 %1875, %v257_v29   ;;  %435 = vperm.xlu0 %1874, %v256_v30  }
  0x50   : > { %450 = vperm.xlu1 %1875, %v259_v31   ;;  %445 = vperm.xlu0 %1874, %v258_v32  }
  0x54   : > { %460 = vperm.xlu1 %1875, %v261_v33   ;;  %455 = vperm.xlu0 %1874, %v260_v34  }
  0x58   : > { %470 = vperm.xlu1 %1875, %v263_v35   ;;  %465 = vperm.xlu0 %1874, %v262_v36  }
  0x5c   : > { %480 = vperm.xlu1 %1875, %v265_v37   ;;  %475 = vperm.xlu0 %1874, %v264_v38  }
  0x60   : > { %490 = vperm.xlu1 %1875, %v267_v39   ;;  %485 = vperm.xlu0 %1874, %v266_v40  }
  0x64   : > { %500 = vperm.xlu1 %1875, %v269_v41   ;;  %495 = vperm.xlu0 %1874, %v268_v42  }
  0x68   : > { %510 = vperm.xlu1 %1875, %v271_v43   ;;  %505 = vperm.xlu0 %1874, %v270_v44  }
  0x6c   : > { %520 = vperm.xlu1 %1875, %v273_v45   ;;  %515 = vperm.xlu0 %1874, %v272_v46  }
  0x70   : > { %530 = vperm.xlu1 %1875, %v275_v47   ;;  %525 = vperm.xlu0 %1874, %v274_v48  }
  0x74   : > { %540 = vperm.xlu1 %1875, %v277_v49   ;;  %535 = vperm.xlu0 %1874, %v276_v50  }
  0x78   : > { %550 = vperm.xlu1 %1875, %v279_v51   ;;  %545 = vperm.xlu0 %1874, %v278_v52  }
  0x7c   : > { %560 = vperm.xlu1 %1875, %v281_v53   ;;  %555 = vperm.xlu0 %1874, %v280_v54  }
  0x80   : > { %570 = vperm.xlu1 %1875, %v283_v55   ;;  %565 = vperm.xlu0 %1874, %v282_v56  }
  0x84   : > { %580 = vperm.xlu1 %1875, %v285_v57   ;;  %575 = vperm.xlu0 %1874, %v284_v58  }
  0x88   : > { %590 = vperm.xlu1 %1875, %v287_v59   ;;  %585 = vperm.xlu0 %1874, %v286_v60  }
  0x8c   : > { %600 = vperm.xlu1 %1875, %v289_v61   ;;  %595 = vperm.xlu0 %1874, %v288_v62  }
  0x90   : > { %610 = vperm.xlu1 %1875, %v291_v63   ;;  %605 = vperm.xlu0 %1874, %v290_v0  }
  0x93   : > { %v306_v1 = vpop.permute.xlu1 %305  ;;  %v296_v2 = vpop.permute.xlu0 %295 }
  0x94   : > { %v619_v12 = vmul.f32 %v2130_v9, %v296_v2  ;;  %v621_v16 = vmul.f32 %v2130_v9, %v306_v1 }
  0x96   : > { %v2140_v17 = vadd.f32 %v2136_v15, %v619_v12  ;;  %v2147_v23 = vadd.f32 %v2136_v15, %v621_v16 }
  0x97   : > { %v311_v3 = vpop.permute.xlu1 %310  ;;  %v301_v4 = vpop.permute.xlu0 %300 }
  0x98   : > { %v620_v18 = vmul.f32 %v2130_v9, %v301_v4  ;;  %v622_v21 = vmul.f32 %v2130_v9, %v311_v3  ;;  %v757_v22 = vsel %vm756_vm0, %v2140_v17, 0.0  ;;  %v763_v29 = vsel %vm756_vm0, %v2147_v23, 0.0 }
  0x9a   : > { %v2151_v27 = vadd.f32 %v2136_v15, %v620_v18  ;;  %v2157_v30 = vadd.f32 %v2136_v15, %v622_v21 }
  0x9b   : > { %v321_v5 = vpop.permute.xlu1 %320  ;;  %v316_v6 = vpop.permute.xlu0 %315 }
  0x9c   : > { %v623_v24 = vmul.f32 %v2130_v9, %v316_v6  ;;  %v624_v28 = vmul.f32 %v2130_v9, %v321_v5  ;;  %v760_v34 = vsel %vm756_vm0, %v2151_v27, 0.0  ;;  %v766_v37 = vsel %vm756_vm0, %v2157_v30, 0.0 }
  0x9e   : > { %v2163_v35 = vadd.f32 %v2136_v15, %v623_v24  ;;  %v2169_v38 = vadd.f32 %v2136_v15, %v624_v28 }
  0x9f   : > { %v331_v7 = vpop.permute.xlu1 %330  ;;  %v326_v8 = vpop.permute.xlu0 %325 }
  0xa0   : > { %v625_v31 = vmul.f32 %v2130_v9, %v326_v8  ;;  %v626_v36 = vmul.f32 %v2130_v9, %v331_v7  ;;  %v769_v42 = vsel %vm756_vm0, %v2163_v35, 0.0  ;;  %v772_v45 = vsel %vm756_vm0, %v2169_v38, 0.0 }
  0xa2   : > { %v2175_v43 = vadd.f32 %v2136_v15, %v625_v31  ;;  %v2181_v46 = vadd.f32 %v2136_v15, %v626_v36 }
  0xa3   : > { %v341_v10 = vpop.permute.xlu1 %340  ;;  %v336_v11 = vpop.permute.xlu0 %335 }
  0xa4   : > { %v627_v39 = vmul.f32 %v2130_v9, %v336_v11  ;;  %v628_v44 = vmul.f32 %v2130_v9, %v341_v10  ;;  %v775_v50 = vsel %vm756_vm0, %v2175_v43, 0.0  ;;  %v778_v53 = vsel %vm756_vm0, %v2181_v46, 0.0 }
  0xa6   : > { %v2187_v51 = vadd.f32 %v2136_v15, %v627_v39  ;;  %v2193_v54 = vadd.f32 %v2136_v15, %v628_v44 }
  0xa7   : > { %v351_v13 = vpop.permute.xlu1 %350  ;;  %v346_v14 = vpop.permute.xlu0 %345 }
  0xa8   : > { %v629_v47 = vmul.f32 %v2130_v9, %v346_v14  ;;  %v630_v52 = vmul.f32 %v2130_v9, %v351_v13  ;;  %v781_v58 = vsel %vm756_vm0, %v2187_v51, 0.0  ;;  %v784_v61 = vsel %vm756_vm0, %v2193_v54, 0.0 }
  0xaa   : > { %v2199_v59 = vadd.f32 %v2136_v15, %v629_v47  ;;  %v2205_v62 = vadd.f32 %v2136_v15, %v630_v52 }
  0xab   : > { %v361_v19 = vpop.permute.xlu1 %360  ;;  %v356_v20 = vpop.permute.xlu0 %355 }
  0xac   : > { %v631_v55 = vmul.f32 %v2130_v9, %v356_v20  ;;  %v632_v60 = vmul.f32 %v2130_v9, %v361_v19  ;;  %v787_v2 = vsel %vm756_vm0, %v2199_v59, 0.0  ;;  %v790_v5 = vsel %vm756_vm0, %v2205_v62, 0.0 }
  0xae   : > { %v2211_v3 = vadd.f32 %v2136_v15, %v631_v55  ;;  %v2217_v6 = vadd.f32 %v2136_v15, %v632_v60 }
  0xaf   : > { %v371_v25 = vpop.permute.xlu1 %370  ;;  %758 = vadd.xlane.f32.xlu0 %v757_v22  ;;  %v366_v26 = vpop.permute.xlu0 %365 }
  0xb0   : > { %v633_v63 = vmul.f32 %v2130_v9, %v366_v26  ;;  %v634_v4 = vmul.f32 %v2130_v9, %v371_v25  ;;  %v793_v11 = vsel %vm756_vm0, %v2211_v3, 0.0  ;;  %v796_v14 = vsel %vm756_vm0, %v2217_v6, 0.0 }
  0xb2   : > { %v2223_v12 = vadd.f32 %v2136_v15, %v633_v63  ;;  %v2229_v16 = vadd.f32 %v2136_v15, %v634_v4 }
  0xb3   : > { %v381_v32 = vpop.permute.xlu1 %380  ;;  %764 = vadd.xlane.f32.xlu0 %v763_v29  ;;  %v376_v33 = vpop.permute.xlu0 %375 }
  0xb4   : > { %761 = vadd.xlane.f32.xlu1 %v760_v34  ;;  %v635_v7 = vmul.f32 %v2130_v9, %v376_v33  ;;  %v636_v13 = vmul.f32 %v2130_v9, %v381_v32  ;;  %v799_v21 = vsel %vm756_vm0, %v2223_v12, 0.0  ;;  %v802_v25 = vsel %vm756_vm0, %v2229_v16, 0.0 }
  0xb6   : > { %v2235_v22 = vadd.f32 %v2136_v15, %v635_v7  ;;  %v2241_v26 = vadd.f32 %v2136_v15, %v636_v13 }
  0xb7   : > { %v391_v40 = vpop.permute.xlu1 %390  ;;  %767 = vadd.xlane.f32.xlu0 %v766_v37  ;;  %v386_v41 = vpop.permute.xlu0 %385 }
  0xb8   : > { %770 = vadd.xlane.f32.xlu1 %v769_v42  ;;  %v637_v18 = vmul.f32 %v2130_v9, %v386_v41  ;;  %v638_v24 = vmul.f32 %v2130_v9, %v391_v40  ;;  %v805_v32 = vsel %vm756_vm0, %v2235_v22, 0.0  ;;  %v808_v36 = vsel %vm756_vm0, %v2241_v26, 0.0 }
  0xba   : > { %v2247_v33 = vadd.f32 %v2136_v15, %v637_v18  ;;  %v2253_v37 = vadd.f32 %v2136_v15, %v638_v24 }
  0xbb   : > { %v401_v48 = vpop.permute.xlu1 %400  ;;  %773 = vadd.xlane.f32.xlu0 %v772_v45  ;;  %v396_v49 = vpop.permute.xlu0 %395 }
  0xbc   : > { %776 = vadd.xlane.f32.xlu1 %v775_v50  ;;  %v639_v28 = vmul.f32 %v2130_v9, %v396_v49  ;;  %v640_v34 = vmul.f32 %v2130_v9, %v401_v48  ;;  %v811_v42 = vsel %vm756_vm0, %v2247_v33, 0.0  ;;  %v814_v47 = vsel %vm756_vm0, %v2253_v37, 0.0 }
  0xbe   : > { %v2259_v44 = vadd.f32 %v2136_v15, %v639_v28  ;;  %v2265_v48 = vadd.f32 %v2136_v15, %v640_v34 }
  0xbf   : > { %v411_v56 = vpop.permute.xlu1 %410  ;;  %779 = vadd.xlane.f32.xlu0 %v778_v53  ;;  %v406_v57 = vpop.permute.xlu0 %405 }
  0xc0   : > { %782 = vadd.xlane.f32.xlu1 %v781_v58  ;;  %v641_v39 = vmul.f32 %v2130_v9, %v406_v57  ;;  %v642_v45 = vmul.f32 %v2130_v9, %v411_v56  ;;  %v817_v53 = vsel %vm756_vm0, %v2259_v44, 0.0  ;;  %v820_v57 = vsel %vm756_vm0, %v2265_v48, 0.0 }
  0xc2   : > { %v2271_v55 = vadd.f32 %v2136_v15, %v641_v39  ;;  %v2277_v58 = vadd.f32 %v2136_v15, %v642_v45 }
  0xc3   : > { %v421_v0 = vpop.permute.xlu1 %420  ;;  %785 = vadd.xlane.f32.xlu0 %v784_v61  ;;  %v416_v1 = vpop.permute.xlu0 %415 }
  0xc4   : > { %788 = vadd.xlane.f32.xlu1 %v787_v2  ;;  %v643_v49 = vmul.f32 %v2130_v9, %v416_v1  ;;  %v644_v56 = vmul.f32 %v2130_v9, %v421_v0  ;;  %v823_v1 = vsel %vm756_vm0, %v2271_v55, 0.0  ;;  %v826_v4 = vsel %vm756_vm0, %v2277_v58, 0.0 }
  0xc6   : > { %v2283_v2 = vadd.f32 %v2136_v15, %v643_v49 }
  0xc7   : > { %v431_v8 = vpop.permute.xlu1 %430  ;;  %791 = vadd.xlane.f32.xlu0 %v790_v5  ;;  %v426_v10 = vpop.permute.xlu0 %425  ;;  %v2289_v5 = vadd.f32 %v2136_v15, %v644_v56 }
  0xc8   : > { %794 = vadd.xlane.f32.xlu1 %v793_v11  ;;  %v645_v60 = vmul.f32 %v2130_v9, %v426_v10  ;;  %v646_v0 = vmul.f32 %v2130_v9, %v431_v8  ;;  %v829_v13 = vsel %vm756_vm0, %v2283_v2, 0.0 }
  0xc9   : > { %v832_v18 = vsel %vm756_vm0, %v2289_v5, 0.0 }
  0xcb   : > { %v441_v19 = vpop.permute.xlu1 %440  ;;  %797 = vadd.xlane.f32.xlu0 %v796_v14  ;;  %v436_v20 = vpop.permute.xlu0 %435  ;;  %v2295_v14 = vadd.f32 %v2136_v15, %v645_v60 }
  0xcc   : > { %800 = vadd.xlane.f32.xlu1 %v799_v21  ;;  %v647_v7 = vmul.f32 %v2130_v9, %v436_v20  ;;  %v648_v8 = vmul.f32 %v2130_v9, %v441_v19  ;;  %v2301_v21 = vadd.f32 %v2136_v15, %v646_v0 }
  0xcd   : > { %v835_v28 = vsel %vm756_vm0, %v2295_v14, 0.0 }
  0xce   : > { %v838_v34 = vsel %vm756_vm0, %v2301_v21, 0.0 }
  0xcf   : > { %v451_v29 = vpop.permute.xlu1 %450  ;;  %803 = vadd.xlane.f32.xlu0 %v802_v25  ;;  %v446_v31 = vpop.permute.xlu0 %445 }
  0xd0   : > { %806 = vadd.xlane.f32.xlu1 %v805_v32  ;;  %v649_v20 = vmul.f32 %v2130_v9, %v446_v31  ;;  %v2307_v32 = vadd.f32 %v2136_v15, %v647_v7  ;;  %v650_v19 = vmul.f32 %v2130_v9, %v451_v29 }
  0xd2   : > { %v841_v45 = vsel %vm756_vm0, %v2307_v32, 0.0 }
  0xd3   : > { %v461_v40 = vpop.permute.xlu1 %460  ;;  %809 = vadd.xlane.f32.xlu0 %v808_v36  ;;  %v456_v41 = vpop.permute.xlu0 %455  ;;  %v2313_v36 = vadd.f32 %v2136_v15, %v648_v8 }
  0xd4   : > { %812 = vadd.xlane.f32.xlu1 %v811_v42  ;;  %v651_v31 = vmul.f32 %v2130_v9, %v456_v41  ;;  %v652_v29 = vmul.f32 %v2130_v9, %v461_v40 }
  0xd5   : > { %v844_v49 = vsel %vm756_vm0, %v2313_v36, 0.0 }
  0xd6   : > { %v2331_v60 = vadd.f32 %v2136_v15, %v651_v31 }
  0xd7   : > { %v471_v50 = vpop.permute.xlu1 %470  ;;  %815 = vadd.xlane.f32.xlu0 %v814_v47  ;;  %v466_v52 = vpop.permute.xlu0 %465  ;;  %v2319_v47 = vadd.f32 %v2136_v15, %v649_v20 }
  0xd8   : > { %818 = vadd.xlane.f32.xlu1 %v817_v53  ;;  %v2325_v53 = vadd.f32 %v2136_v15, %v650_v19  ;;  %v653_v41 = vmul.f32 %v2130_v9, %v466_v52  ;;  %v654_v40 = vmul.f32 %v2130_v9, %v471_v50  ;;  %v853_v7 = vsel %vm756_vm0, %v2331_v60, 0.0 }
  0xda   : > { %v850_v0 = vsel %vm756_vm0, %v2325_v53, 0.0  ;;  %v2349_v20 = vadd.f32 %v2136_v15, %v654_v40 }
  0xdb   : > { %v481_v61 = vpop.permute.xlu1 %480  ;;  %821 = vadd.xlane.f32.xlu0 %v820_v57  ;;  %v476_v63 = vpop.permute.xlu0 %475  ;;  %v847_v57 = vsel %vm756_vm0, %v2319_v47, 0.0 }
  0xdc   : > { %824 = vadd.xlane.f32.xlu1 %v823_v1  ;;  %v655_v52 = vmul.f32 %v2130_v9, %v476_v63 }
  0xdf   : > { %v491_v10 = vpop.permute.xlu1 %490  ;;  %827 = vadd.xlane.f32.xlu0 %v826_v4  ;;  %v486_v11 = vpop.permute.xlu0 %485  ;;  %v2337_v4 = vadd.f32 %v2136_v15, %v652_v29 }
  0xe0   : > { %830 = vadd.xlane.f32.xlu1 %v829_v13  ;;  %v2343_v13 = vadd.f32 %v2136_v15, %v653_v41  ;;  %v658_v31 = vmul.f32 %v2130_v9, %v491_v10 }
  0xe1   : > { %v856_v50 = vsel %vm756_vm0, %v2337_v4, 0.0 }
  0xe2   : > { %v859_v19 = vsel %vm756_vm0, %v2343_v13, 0.0 }
  0xe3   : > { %v501_v24 = vpop.permute.xlu1 %500  ;;  %833 = vadd.xlane.f32.xlu0 %v832_v18  ;;  %v496_v25 = vpop.permute.xlu0 %495  ;;  %v656_v18 = vmul.f32 %v2130_v9, %v481_v61 }
  0xe4   : > { %836 = vadd.xlane.f32.xlu1 %v835_v28  ;;  %v657_v28 = vmul.f32 %v2130_v9, %v486_v11  ;;  %v659_v11 = vmul.f32 %v2130_v9, %v496_v25  ;;  %v660_v10 = vmul.f32 %v2130_v9, %v501_v24 }
  0xe5   : > { %v2361_v29 = vadd.f32 %v2136_v15, %v656_v18 }
  0xe6   : > { %v2367_v41 = vadd.f32 %v2136_v15, %v657_v28  ;;  %v2385_v28 = vadd.f32 %v2136_v15, %v660_v10 }
  0xe7   : > { %v511_v39 = vpop.permute.xlu1 %510  ;;  %839 = vadd.xlane.f32.xlu0 %v838_v34  ;;  %v506_v42 = vpop.permute.xlu0 %505  ;;  %v2355_v34 = vadd.f32 %v2136_v15, %v655_v52  ;;  %v868_v40 = vsel %vm756_vm0, %v2361_v29, 0.0 }
  0xe8   : > { %842 = vadd.xlane.f32.xlu1 %v841_v45  ;;  %v862_v45 = vsel %vm756_vm0, %v2349_v20, 0.0  ;;  %v661_v52 = vmul.f32 %v2130_v9, %v506_v42  ;;  %v871_v25 = vsel %vm756_vm0, %v2367_v41, 0.0 }
  0xeb   : > { %845 = vadd.xlane.f32.xlu0 %v844_v49  ;;  %v516_v56 = vpop.permute.xlu0 %515  ;;  %v521_v1 = vpop.permute.xlu1 %520  ;;  %v865_v49 = vsel %vm756_vm0, %v2355_v34, 0.0 }
  0xec   : > { %848 = vadd.xlane.f32.xlu1 %v847_v57 }
  0xef   : > { %851 = vadd.xlane.f32.xlu0 %v850_v0  ;;  %v526_v8 = vpop.permute.xlu0 %525  ;;  %v531_v63 = vpop.permute.xlu1 %530  ;;  %v2373_v0 = vadd.f32 %v2136_v15, %v658_v31 }
  0xf0   : > { %854 = vadd.xlane.f32.xlu1 %v853_v7  ;;  %v2379_v7 = vadd.f32 %v2136_v15, %v659_v11  ;;  %v664_v11 = vmul.f32 %v2130_v9, %v521_v1  ;;  %v666_v1 = vmul.f32 %v2130_v9, %v531_v63 }
  0xf1   : > { %v874_v24 = vsel %vm756_vm0, %v2373_v0, 0.0 }
  0xf2   : > { %v877_v31 = vsel %vm756_vm0, %v2379_v7, 0.0 }
  0xf3   : > { %857 = vadd.xlane.f32.xlu0 %v856_v50  ;;  %v536_v61 = vpop.permute.xlu0 %535  ;;  %v541_v57 = vpop.permute.xlu1 %540  ;;  %v662_v50 = vmul.f32 %v2130_v9, %v511_v39 }
  0xf4   : > { %860 = vadd.xlane.f32.xlu1 %v859_v19  ;;  %v663_v19 = vmul.f32 %v2130_v9, %v516_v56  ;;  %v665_v56 = vmul.f32 %v2130_v9, %v526_v8 }
  0xf5   : > { %v2397_v10 = vadd.f32 %v2136_v15, %v662_v50  ;;  %v667_v50 = vmul.f32 %v2130_v9, %v536_v61 }
  0xf7   : > { %863 = vadd.xlane.f32.xlu0 %v862_v45  ;;  %v546_v18 = vpop.permute.xlu0 %545  ;;  %v551_v42 = vpop.permute.xlu1 %550  ;;  %v2391_v45 = vadd.f32 %v2136_v15, %v661_v52  ;;  %3271 = vst [vmem:[#allocation2_spill] sm:$0xff] %v2397_v10 }
  0xf8   : > { %866 = vadd.xlane.f32.xlu1 %v865_v49  ;;  %v880_v49 = vsel %vm756_vm0, %v2385_v28, 0.0 }
  0xfb   : > { %869 = vadd.xlane.f32.xlu0 %v868_v40  ;;  %v556_v39 = vpop.permute.xlu0 %555  ;;  %v883_v40 = vsel %vm756_vm0, %v2391_v45, 0.0  ;;  %v561_v52 = vpop.permute.xlu1 %560 }
  0xfc   : > { %872 = vadd.xlane.f32.xlu1 %v871_v25  ;;  %v2403_v25 = vadd.f32 %v2136_v15, %v663_v19 }
  0xfe   : > { %v889_v8 = vsel %vm756_vm0, %v2403_v25, 0.0 }
  0xff   : > { %875 = vadd.xlane.f32.xlu0 %v874_v24  ;;  %v886_v24 = vsel %vm756_vm0, %v2397_v10, 0.0  ;;  %v566_v19 = vpop.permute.xlu0 %565  ;;  %v2421_v10 = vadd.f32 %v2136_v15, %v666_v1  ;;  %v571_v61 = vpop.permute.xlu1 %570 }
 0x100   : > { %878 = vadd.xlane.f32.xlu1 %v877_v31  ;;  %v2409_v31 = vadd.f32 %v2136_v15, %v664_v11  ;;  %v669_v11 = vmul.f32 %v2130_v9, %v546_v18  ;;  %v671_v18 = vmul.f32 %v2130_v9, %v556_v39 }
 0x101   : > { %3274 = vst [vmem:[#allocation5_spill] sm:$0xff] %v2421_v10 }
 0x102   : > { %3272 = vst [vmem:[#allocation3_spill] sm:$0xff] %v2409_v31  ;;  %v892_v63 = vsel %vm756_vm0, %v2409_v31, 0.0  ;;  %v898_v31 = vsel %vm756_vm0, %v2421_v10, 0.0 }
 0x103   : > { %881 = vadd.xlane.f32.xlu0 %v880_v49  ;;  %v2415_v49 = vadd.f32 %v2136_v15, %v665_v56  ;;  %v2427_v56 = vadd.f32 %v2136_v15, %v667_v50  ;;  %v581_v50 = vpop.permute.xlu1 %580 }
 0x104   : > { %884 = vadd.xlane.f32.xlu1 %v883_v40  ;;  %v668_v40 = vmul.f32 %v2130_v9, %v541_v57  ;;  %v576_v57 = vpop.permute.xlu0 %575 }
 0x105   : > { %3273 = vst [vmem:[#allocation4_spill] sm:$0xff] %v2415_v49 }
 0x106   : > { %v2433_v1 = vadd.f32 %v2136_v15, %v668_v40  ;;  %v673_v40 = vmul.f32 %v2130_v9, %v566_v19 }
 0x107   : > { %887 = vadd.xlane.f32.xlu0 %v886_v24  ;;  %v895_v24 = vsel %vm756_vm0, %v2415_v49, 0.0  ;;  %v2439_v49 = vadd.f32 %v2136_v15, %v669_v11  ;;  %v591_v19 = vpop.permute.xlu1 %590 }
 0x108   : > { %890 = vadd.xlane.f32.xlu1 %v889_v8  ;;  %v670_v8 = vmul.f32 %v2130_v9, %v551_v42  ;;  %3275 = vst [vmem:[#allocation6_spill] sm:$0xff] %v2433_v1  ;;  %v672_v42 = vmul.f32 %v2130_v9, %v561_v52  ;;  %v586_v11 = vpop.permute.xlu0 %585 }
 0x109   : > { %v907_v39 = vsel %vm756_vm0, %v2439_v49, 0.0 }
 0x10a   : > { %v2445_v10 = vadd.f32 %v2136_v15, %v670_v8  ;;  %v675_v8 = vmul.f32 %v2130_v9, %v576_v57  ;;  %v677_v57 = vmul.f32 %v2130_v9, %v586_v11 }
 0x10b   : > { %893 = vadd.xlane.f32.xlu0 %v892_v63  ;;  %v901_v63 = vsel %vm756_vm0, %v2427_v56, 0.0 }
 0x10c   : > { %896 = vadd.xlane.f32.xlu1 %v895_v24  ;;  %v904_v24 = vsel %vm756_vm0, %v2433_v1, 0.0  ;;  %3276 = vst [vmem:[#allocation7_spill] sm:$0xff] %v2445_v10  ;;  %v910_v52 = vsel %vm756_vm0, %v2445_v10, 0.0  ;;  %v2457_v1 = vadd.f32 %v2136_v15, %v672_v42  ;;  %v2487_v11 = vadd.f32 %v2136_v15, %v677_v57 }
 0x10e   : > { %3278 = vst [vmem:[#allocation9_spill] sm:$0xff] %v2457_v1  ;;  %v916_v10 = vsel %vm756_vm0, %v2457_v1, 0.0 }
 0x10f   : > { %899 = vadd.xlane.f32.xlu0 %v898_v31  ;;  %v2451_v31 = vadd.f32 %v2136_v15, %v671_v18  ;;  %v2463_v18 = vadd.f32 %v2136_v15, %v673_v40  ;;  %v601_v40 = vpop.permute.xlu1 %600 }
 0x110   : > { %902 = vadd.xlane.f32.xlu1 %v901_v63  ;;  %v674_v63 = vmul.f32 %v2130_v9, %v571_v61  ;;  %v596_v61 = vpop.permute.xlu0 %595 }
 0x111   : > { %3277 = vst [vmem:[#allocation8_spill] sm:$0xff] %v2451_v31 }
 0x112   : > { %v2469_v42 = vadd.f32 %v2136_v15, %v674_v63  ;;  %v679_v63 = vmul.f32 %v2130_v9, %v596_v61 }
 0x113   : > { %905 = vadd.xlane.f32.xlu0 %v904_v24  ;;  %v913_v24 = vsel %vm756_vm0, %v2451_v31, 0.0  ;;  %v2475_v31 = vadd.f32 %v2136_v15, %v675_v8 }
 0x114   : > { %908 = vadd.xlane.f32.xlu1 %v907_v39  ;;  %v676_v39 = vmul.f32 %v2130_v9, %v581_v50  ;;  %3279 = vst [vmem:[#allocation10_spill] sm:$0xff] %v2469_v42  ;;  %v678_v50 = vmul.f32 %v2130_v9, %v591_v19  ;;  %v606_v8 = vpop.permute.xlu0 %605  ;;  %v2499_v57 = vadd.f32 %v2136_v15, %v679_v63 }
 0x115   : > { %v681_v61 = vmul.f32 %v2130_v9, %v606_v8 }
 0x116   : > { %v2481_v1 = vadd.f32 %v2136_v15, %v676_v39  ;;  %v611_v39 = vpop.permute.xlu1 %610 }
 0x117   : > { %911 = vadd.xlane.f32.xlu0 %v910_v52  ;;  %v919_v52 = vsel %vm756_vm0, %v2463_v18, 0.0  ;;  %v2510_v8 = vadd.f32 %v2136_v15, %v681_v61 }
 0x118   : > { %914 = vadd.xlane.f32.xlu1 %v913_v24  ;;  %v922_v24 = vsel %vm756_vm0, %v2469_v42, 0.0  ;;  %3280 = vst [vmem:[#allocation11_spill] sm:$0xff] %v2481_v1  ;;  %v928_v19 = vsel %vm756_vm0, %v2481_v1, 0.0  ;;  %v2493_v42 = vadd.f32 %v2136_v15, %v678_v50  ;;  %v937_v50 = vsel %vm756_vm0, %v2499_v57, 0.0 }
 0x11b   : > { %917 = vadd.xlane.f32.xlu0 %v916_v10  ;;  %v925_v10 = vsel %vm756_vm0, %v2475_v31, 0.0 }
 0x11c   : > { %920 = vadd.xlane.f32.xlu1 %v919_v52  ;;  %v680_v52 = vmul.f32 %v2130_v9, %v601_v40  ;;  %v934_v40 = vsel %vm756_vm0, %v2493_v42, 0.0 }
 0x11e   : > { %v2505_v1 = vadd.f32 %v2136_v15, %v680_v52 }
 0x11f   : > { %923 = vadd.xlane.f32.xlu0 %v922_v24  ;;  %v931_v24 = vsel %vm756_vm0, %v2487_v11, 0.0 }
 0x120   : > { %926 = vadd.xlane.f32.xlu1 %v925_v10  ;;  %v682_v10 = vmul.f32 %v2130_v9, %v611_v39  ;;  %3281 = vst [vmem:[#allocation12_spill] sm:$0xff] %v2505_v1  ;;  %v940_v63 = vsel %vm756_vm0, %v2505_v1, 0.0  ;;  %v943_v9 = vsel %vm756_vm0, %v2510_v8, 0.0 }
 0x123   : > { %929 = vadd.xlane.f32.xlu0 %v928_v19  ;;  %v2515_v19 = vadd.f32 %v2136_v15, %v682_v10 }
 0x124   : > { %932 = vadd.xlane.f32.xlu1 %v931_v24 }
 0x125   : > { %3282 = vst [vmem:[#allocation13_spill] sm:$0xff] %v2515_v19  ;;  %v946_v52 = vsel %vm756_vm0, %v2515_v19, 0.0 }
 0x127   : > { %935 = vadd.xlane.f32.xlu0 %v934_v40 }
 0x128   : > { %938 = vadd.xlane.f32.xlu1 %v937_v50 }
 0x12b   : > { %941 = vadd.xlane.f32.xlu0 %v940_v63 }
 0x12c   : > { %944 = vadd.xlane.f32.xlu1 %v943_v9 }
 0x12f   : > { %947 = vadd.xlane.f32.xlu0 %v946_v52 }
 0x13c   : > { %v759_v39 = vpop.xlane.xlu0 %758 }
 0x13d   : > { %v950_v24 = vmul.f32 0.125, %v759_v39 }
 0x13f   : > { %v2522_v61 = vsub.f32 %v2140_v17, %v950_v24 }
 0x140   : > { %v765_v40 = vpop.xlane.xlu0 %764 }
 0x141   : > { %3283 = vst [vmem:[#allocation14_spill] sm:$0xff] %v2522_v61  ;;  %v952_v50 = vmul.f32 0.125, %v765_v40  ;;  %v762_v1 = vpop.xlane.xlu1 %761  ;;  %v1078_v15 = vmul.f32 %v2522_v61, %v2522_v61 }
 0x142   : > { %v951_v10 = vmul.f32 0.125, %v762_v1 }
 0x143   : > { %v2527_v63 = vsub.f32 %v2147_v23, %v952_v50  ;;  %v1142_v9 = vsel %vm756_vm0, %v1078_v15, 0.0 }
 0x144   : > { %v2531_v19 = vsub.f32 %v2151_v27, %v951_v10  ;;  %1143 = vadd.xlane.f32.xlu1 %v1142_v9  ;;  %v768_v52 = vpop.xlane.xlu0 %767 }
 0x145   : > { %v953_v39 = vmul.f32 0.125, %v768_v52  ;;  %v771_v17 = vpop.xlane.xlu1 %770  ;;  %v1080_v24 = vmul.f32 %v2527_v63, %v2527_v63 }
 0x146   : > { %v954_v40 = vmul.f32 0.125, %v771_v17  ;;  %v1079_v61 = vmul.f32 %v2531_v19, %v2531_v19 }
 0x147   : > { %v2538_v1 = vsub.f32 %v2157_v30, %v953_v39  ;;  %v1148_v23 = vsel %vm756_vm0, %v1080_v24, 0.0 }
 0x148   : > { %v2542_v50 = vsub.f32 %v2163_v35, %v954_v40  ;;  %1149 = vadd.xlane.f32.xlu1 %v1148_v23  ;;  %v774_v27 = vpop.xlane.xlu0 %773  ;;  %v1145_v15 = vsel %vm756_vm0, %v1079_v61, 0.0 }
 0x149   : > { %v955_v10 = vmul.f32 0.125, %v774_v27  ;;  %v777_v9 = vpop.xlane.xlu1 %776  ;;  %1146 = vadd.xlane.f32.xlu0 %v1145_v15  ;;  %v1081_v52 = vmul.f32 %v2538_v1, %v2538_v1 }
 0x14a   : > { %v956_v17 = vmul.f32 0.125, %v777_v9  ;;  %v1082_v30 = vmul.f32 %v2542_v50, %v2542_v50 }
 0x14b   : > { %v2550_v39 = vsub.f32 %v2169_v38, %v955_v10  ;;  %v1151_v35 = vsel %vm756_vm0, %v1081_v52, 0.0 }
 0x14c   : > { %v2554_v24 = vsub.f32 %v2175_v43, %v956_v17  ;;  %v780_v40 = vpop.xlane.xlu0 %779  ;;  %v1154_v61 = vsel %vm756_vm0, %v1082_v30, 0.0 }
 0x14d   : > { %v957_v23 = vmul.f32 0.125, %v780_v40  ;;  %v783_v27 = vpop.xlane.xlu1 %782  ;;  %1155 = vadd.xlane.f32.xlu1 %v1154_v61  ;;  %1152 = vadd.xlane.f32.xlu0 %v1151_v35  ;;  %v1083_v15 = vmul.f32 %v2550_v39, %v2550_v39 }
 0x14e   : > { %v958_v9 = vmul.f32 0.125, %v783_v27  ;;  %v1084_v38 = vmul.f32 %v2554_v24, %v2554_v24 }
 0x14f   : > { %v2562_v10 = vsub.f32 %v2181_v46, %v957_v23  ;;  %v1157_v43 = vsel %vm756_vm0, %v1083_v15, 0.0 }
 0x150   : > { %v2566_v52 = vsub.f32 %v2187_v51, %v958_v9  ;;  %v786_v17 = vpop.xlane.xlu0 %785  ;;  %v1160_v30 = vsel %vm756_vm0, %v1084_v38, 0.0 }
 0x151   : > { %v959_v40 = vmul.f32 0.125, %v786_v17  ;;  %v789_v35 = vpop.xlane.xlu1 %788  ;;  %1161 = vadd.xlane.f32.xlu1 %v1160_v30  ;;  %1158 = vadd.xlane.f32.xlu0 %v1157_v43  ;;  %v1085_v61 = vmul.f32 %v2562_v10, %v2562_v10 }
 0x152   : > { %v960_v27 = vmul.f32 0.125, %v789_v35  ;;  %v1086_v46 = vmul.f32 %v2566_v52, %v2566_v52 }
 0x153   : > { %v2574_v23 = vsub.f32 %v2193_v54, %v959_v40  ;;  %v1163_v51 = vsel %vm756_vm0, %v1085_v61, 0.0 }
 0x154   : > { %v2578_v15 = vsub.f32 %v2199_v59, %v960_v27  ;;  %v792_v9 = vpop.xlane.xlu0 %791  ;;  %v1166_v38 = vsel %vm756_vm0, %v1086_v46, 0.0 }
 0x155   : > { %v961_v17 = vmul.f32 0.125, %v792_v9  ;;  %v795_v43 = vpop.xlane.xlu1 %794  ;;  %1167 = vadd.xlane.f32.xlu1 %v1166_v38  ;;  %1164 = vadd.xlane.f32.xlu0 %v1163_v51  ;;  %v1087_v30 = vmul.f32 %v2574_v23, %v2574_v23 }
 0x156   : > { %v962_v35 = vmul.f32 0.125, %v795_v43  ;;  %v1088_v54 = vmul.f32 %v2578_v15, %v2578_v15 }
 0x157   : > { %v2586_v40 = vsub.f32 %v2205_v62, %v961_v17  ;;  %v1169_v59 = vsel %vm756_vm0, %v1087_v30, 0.0 }
 0x158   : > { %v2590_v61 = vsub.f32 %v2211_v3, %v962_v35  ;;  %v798_v27 = vpop.xlane.xlu0 %797  ;;  %v1172_v46 = vsel %vm756_vm0, %v1088_v54, 0.0 }
 0x159   : > { %v963_v9 = vmul.f32 0.125, %v798_v27  ;;  %v801_v51 = vpop.xlane.xlu1 %800  ;;  %1173 = vadd.xlane.f32.xlu1 %v1172_v46  ;;  %1170 = vadd.xlane.f32.xlu0 %v1169_v59  ;;  %v1089_v38 = vmul.f32 %v2586_v40, %v2586_v40 }
 0x15a   : > { %v964_v43 = vmul.f32 0.125, %v801_v51  ;;  %v1090_v62 = vmul.f32 %v2590_v61, %v2590_v61 }
 0x15b   : > { %v2598_v17 = vsub.f32 %v2217_v6, %v963_v9  ;;  %v1175_v3 = vsel %vm756_vm0, %v1089_v38, 0.0 }
 0x15c   : > { %v2602_v30 = vsub.f32 %v2223_v12, %v964_v43  ;;  %v804_v35 = vpop.xlane.xlu0 %803  ;;  %v1178_v54 = vsel %vm756_vm0, %v1090_v62, 0.0 }
 0x15d   : > { %v965_v27 = vmul.f32 0.125, %v804_v35  ;;  %v807_v59 = vpop.xlane.xlu1 %806  ;;  %1179 = vadd.xlane.f32.xlu1 %v1178_v54  ;;  %1176 = vadd.xlane.f32.xlu0 %v1175_v3  ;;  %v1091_v46 = vmul.f32 %v2598_v17, %v2598_v17 }
 0x15e   : > { %v966_v51 = vmul.f32 0.125, %v807_v59  ;;  %v1092_v6 = vmul.f32 %v2602_v30, %v2602_v30 }
 0x15f   : > { %v2610_v9 = vsub.f32 %v2229_v16, %v965_v27  ;;  %v1181_v12 = vsel %vm756_vm0, %v1091_v46, 0.0 }
 0x160   : > { %v2614_v38 = vsub.f32 %v2235_v22, %v966_v51  ;;  %v810_v43 = vpop.xlane.xlu0 %809  ;;  %v1184_v62 = vsel %vm756_vm0, %v1092_v6, 0.0 }
 0x161   : > { %v967_v35 = vmul.f32 0.125, %v810_v43  ;;  %v813_v3 = vpop.xlane.xlu1 %812  ;;  %1185 = vadd.xlane.f32.xlu1 %v1184_v62  ;;  %1182 = vadd.xlane.f32.xlu0 %v1181_v12  ;;  %v1093_v54 = vmul.f32 %v2610_v9, %v2610_v9 }
 0x162   : > { %v968_v59 = vmul.f32 0.125, %v813_v3  ;;  %v1094_v16 = vmul.f32 %v2614_v38, %v2614_v38 }
 0x163   : > { %v2622_v27 = vsub.f32 %v2241_v26, %v967_v35  ;;  %v1187_v22 = vsel %vm756_vm0, %v1093_v54, 0.0 }
 0x164   : > { %v2626_v46 = vsub.f32 %v2247_v33, %v968_v59  ;;  %v816_v51 = vpop.xlane.xlu0 %815  ;;  %v1190_v6 = vsel %vm756_vm0, %v1094_v16, 0.0 }
 0x165   : > { %v969_v43 = vmul.f32 0.125, %v816_v51  ;;  %v819_v12 = vpop.xlane.xlu1 %818  ;;  %1191 = vadd.xlane.f32.xlu1 %v1190_v6  ;;  %1188 = vadd.xlane.f32.xlu0 %v1187_v22  ;;  %v1095_v62 = vmul.f32 %v2622_v27, %v2622_v27 }
 0x166   : > { %v970_v3 = vmul.f32 0.125, %v819_v12  ;;  %v1096_v26 = vmul.f32 %v2626_v46, %v2626_v46 }
 0x167   : > { %v2634_v35 = vsub.f32 %v2253_v37, %v969_v43  ;;  %v1193_v33 = vsel %vm756_vm0, %v1095_v62, 0.0 }
 0x168   : > { %v2638_v54 = vsub.f32 %v2259_v44, %v970_v3  ;;  %v822_v59 = vpop.xlane.xlu0 %821  ;;  %v1196_v16 = vsel %vm756_vm0, %v1096_v26, 0.0 }
 0x169   : > { %v971_v51 = vmul.f32 0.125, %v822_v59  ;;  %v825_v22 = vpop.xlane.xlu1 %824  ;;  %1197 = vadd.xlane.f32.xlu1 %v1196_v16  ;;  %1194 = vadd.xlane.f32.xlu0 %v1193_v33  ;;  %v1097_v6 = vmul.f32 %v2634_v35, %v2634_v35 }
 0x16a   : > { %v972_v12 = vmul.f32 0.125, %v825_v22  ;;  %v1098_v37 = vmul.f32 %v2638_v54, %v2638_v54 }
 0x16b   : > { %v2646_v43 = vsub.f32 %v2265_v48, %v971_v51  ;;  %v1199_v44 = vsel %vm756_vm0, %v1097_v6, 0.0 }
 0x16c   : > { %v2650_v62 = vsub.f32 %v2271_v55, %v972_v12  ;;  %v828_v3 = vpop.xlane.xlu0 %827  ;;  %v1202_v26 = vsel %vm756_vm0, %v1098_v37, 0.0 }
 0x16d   : > { %v973_v59 = vmul.f32 0.125, %v828_v3  ;;  %v831_v33 = vpop.xlane.xlu1 %830  ;;  %1203 = vadd.xlane.f32.xlu1 %v1202_v26  ;;  %1200 = vadd.xlane.f32.xlu0 %v1199_v44  ;;  %v1099_v16 = vmul.f32 %v2646_v43, %v2646_v43 }
 0x16e   : > { %v974_v22 = vmul.f32 0.125, %v831_v33  ;;  %v1100_v48 = vmul.f32 %v2650_v62, %v2650_v62 }
 0x16f   : > { %v2658_v51 = vsub.f32 %v2277_v58, %v973_v59  ;;  %v1205_v55 = vsel %vm756_vm0, %v1099_v16, 0.0 }
 0x170   : > { %v2662_v6 = vsub.f32 %v2283_v2, %v974_v22  ;;  %v834_v12 = vpop.xlane.xlu0 %833  ;;  %v1208_v37 = vsel %vm756_vm0, %v1100_v48, 0.0 }
 0x171   : > { %v975_v3 = vmul.f32 0.125, %v834_v12  ;;  %v837_v44 = vpop.xlane.xlu1 %836  ;;  %1209 = vadd.xlane.f32.xlu1 %v1208_v37  ;;  %1206 = vadd.xlane.f32.xlu0 %v1205_v55  ;;  %v1101_v26 = vmul.f32 %v2658_v51, %v2658_v51 }
 0x172   : > { %v976_v33 = vmul.f32 0.125, %v837_v44  ;;  %v1102_v58 = vmul.f32 %v2662_v6, %v2662_v6 }
 0x173   : > { %v2670_v59 = vsub.f32 %v2289_v5, %v975_v3  ;;  %v1211_v2 = vsel %vm756_vm0, %v1101_v26, 0.0 }
 0x174   : > { %v2674_v16 = vsub.f32 %v2295_v14, %v976_v33  ;;  %v840_v22 = vpop.xlane.xlu0 %839  ;;  %v1214_v48 = vsel %vm756_vm0, %v1102_v58, 0.0 }
 0x175   : > { %v977_v12 = vmul.f32 0.125, %v840_v22  ;;  %v843_v55 = vpop.xlane.xlu1 %842  ;;  %1215 = vadd.xlane.f32.xlu1 %v1214_v48  ;;  %1212 = vadd.xlane.f32.xlu0 %v1211_v2  ;;  %v1103_v37 = vmul.f32 %v2670_v59, %v2670_v59 }
 0x176   : > { %v978_v44 = vmul.f32 0.125, %v843_v55  ;;  %v1104_v5 = vmul.f32 %v2674_v16, %v2674_v16 }
 0x177   : > { %v2682_v3 = vsub.f32 %v2301_v21, %v977_v12  ;;  %v1217_v14 = vsel %vm756_vm0, %v1103_v37, 0.0 }
 0x178   : > { %v2686_v26 = vsub.f32 %v2307_v32, %v978_v44  ;;  %v846_v33 = vpop.xlane.xlu0 %845  ;;  %v1220_v58 = vsel %vm756_vm0, %v1104_v5, 0.0 }
 0x179   : > { %v979_v22 = vmul.f32 0.125, %v846_v33  ;;  %v849_v2 = vpop.xlane.xlu1 %848  ;;  %1221 = vadd.xlane.f32.xlu1 %v1220_v58  ;;  %1218 = vadd.xlane.f32.xlu0 %v1217_v14  ;;  %v1105_v48 = vmul.f32 %v2682_v3, %v2682_v3 }
 0x17a   : > { %v980_v55 = vmul.f32 0.125, %v849_v2  ;;  %v1106_v21 = vmul.f32 %v2686_v26, %v2686_v26 }
 0x17b   : > { %v2694_v12 = vsub.f32 %v2313_v36, %v979_v22  ;;  %v1223_v32 = vsel %vm756_vm0, %v1105_v48, 0.0 }
 0x17c   : > { %v2698_v37 = vsub.f32 %v2319_v47, %v980_v55  ;;  %v852_v44 = vpop.xlane.xlu0 %851  ;;  %v1226_v5 = vsel %vm756_vm0, %v1106_v21, 0.0 }
 0x17d   : > { %v981_v33 = vmul.f32 0.125, %v852_v44  ;;  %v855_v14 = vpop.xlane.xlu1 %854  ;;  %1227 = vadd.xlane.f32.xlu1 %v1226_v5  ;;  %1224 = vadd.xlane.f32.xlu0 %v1223_v32  ;;  %v1107_v58 = vmul.f32 %v2694_v12, %v2694_v12 }
 0x17e   : > { %v982_v2 = vmul.f32 0.125, %v855_v14  ;;  %v1108_v36 = vmul.f32 %v2698_v37, %v2698_v37 }
 0x17f   : > { %v2706_v22 = vsub.f32 %v2325_v53, %v981_v33  ;;  %v1229_v47 = vsel %vm756_vm0, %v1107_v58, 0.0 }
 0x180   : > { %v2710_v48 = vsub.f32 %v2331_v60, %v982_v2  ;;  %v858_v55 = vpop.xlane.xlu0 %857  ;;  %v1232_v21 = vsel %vm756_vm0, %v1108_v36, 0.0 }
 0x181   : > { %v983_v44 = vmul.f32 0.125, %v858_v55  ;;  %v861_v32 = vpop.xlane.xlu1 %860  ;;  %1233 = vadd.xlane.f32.xlu1 %v1232_v21  ;;  %1230 = vadd.xlane.f32.xlu0 %v1229_v47  ;;  %v1109_v5 = vmul.f32 %v2706_v22, %v2706_v22 }
 0x182   : > { %v984_v14 = vmul.f32 0.125, %v861_v32  ;;  %v1110_v53 = vmul.f32 %v2710_v48, %v2710_v48 }
 0x183   : > { %v2718_v33 = vsub.f32 %v2337_v4, %v983_v44  ;;  %v1235_v60 = vsel %vm756_vm0, %v1109_v5, 0.0 }
 0x184   : > { %v2722_v58 = vsub.f32 %v2343_v13, %v984_v14  ;;  %v864_v2 = vpop.xlane.xlu0 %863  ;;  %v1238_v36 = vsel %vm756_vm0, %v1110_v53, 0.0 }
 0x185   : > { %v985_v55 = vmul.f32 0.125, %v864_v2  ;;  %v867_v47 = vpop.xlane.xlu1 %866  ;;  %1239 = vadd.xlane.f32.xlu1 %v1238_v36  ;;  %1236 = vadd.xlane.f32.xlu0 %v1235_v60  ;;  %v1111_v21 = vmul.f32 %v2718_v33, %v2718_v33 }
 0x186   : > { %v986_v32 = vmul.f32 0.125, %v867_v47  ;;  %v1112_v4 = vmul.f32 %v2722_v58, %v2722_v58 }
 0x187   : > { %v2730_v44 = vsub.f32 %v2349_v20, %v985_v55  ;;  %v1241_v13 = vsel %vm756_vm0, %v1111_v21, 0.0 }
 0x188   : > { %v2734_v5 = vsub.f32 %v2355_v34, %v986_v32  ;;  %v870_v14 = vpop.xlane.xlu0 %869  ;;  %v1244_v53 = vsel %vm756_vm0, %v1112_v4, 0.0 }
 0x189   : > { %v987_v2 = vmul.f32 0.125, %v870_v14  ;;  %v873_v60 = vpop.xlane.xlu1 %872  ;;  %1245 = vadd.xlane.f32.xlu1 %v1244_v53  ;;  %1242 = vadd.xlane.f32.xlu0 %v1241_v13  ;;  %v1113_v36 = vmul.f32 %v2730_v44, %v2730_v44 }
 0x18a   : > { %v988_v47 = vmul.f32 0.125, %v873_v60  ;;  %v1114_v20 = vmul.f32 %v2734_v5, %v2734_v5 }
 0x18b   : > { %v2742_v55 = vsub.f32 %v2361_v29, %v987_v2  ;;  %v1247_v34 = vsel %vm756_vm0, %v1113_v36, 0.0 }
 0x18c   : > { %v2746_v21 = vsub.f32 %v2367_v41, %v988_v47  ;;  %v876_v32 = vpop.xlane.xlu0 %875  ;;  %v1250_v4 = vsel %vm756_vm0, %v1114_v20, 0.0 }
 0x18d   : > { %v989_v14 = vmul.f32 0.125, %v876_v32  ;;  %v879_v13 = vpop.xlane.xlu1 %878  ;;  %1251 = vadd.xlane.f32.xlu1 %v1250_v4  ;;  %1248 = vadd.xlane.f32.xlu0 %v1247_v34  ;;  %v1115_v53 = vmul.f32 %v2742_v55, %v2742_v55 }
 0x18e   : > { %v990_v60 = vmul.f32 0.125, %v879_v13  ;;  %v1116_v29 = vmul.f32 %v2746_v21, %v2746_v21 }
 0x18f   : > { %v2754_v2 = vsub.f32 %v2373_v0, %v989_v14  ;;  %v1253_v41 = vsel %vm756_vm0, %v1115_v53, 0.0 }
 0x190   : > { %v2758_v36 = vsub.f32 %v2379_v7, %v990_v60  ;;  %v882_v47 = vpop.xlane.xlu0 %881  ;;  %v1256_v20 = vsel %vm756_vm0, %v1116_v29, 0.0 }
 0x191   : > { %3284 = vst [vmem:[#allocation15_spill] sm:$0xff] %v2754_v2  ;;  %v991_v32 = vmul.f32 0.125, %v882_v47  ;;  %v885_v34 = vpop.xlane.xlu1 %884  ;;  %1257 = vadd.xlane.f32.xlu1 %v1256_v20  ;;  %1254 = vadd.xlane.f32.xlu0 %v1253_v41  ;;  %v1117_v4 = vmul.f32 %v2754_v2, %v2754_v2 }
 0x192   : > { %v992_v13 = vmul.f32 0.125, %v885_v34  ;;  %v1118_v0 = vmul.f32 %v2758_v36, %v2758_v36 }
 0x193   : > { %v2766_v14 = vsub.f32 %v2385_v28, %v991_v32  ;;  %v1259_v7 = vsel %vm756_vm0, %v1117_v4, 0.0  ;;  %v3286_v32 = vld [vmem:[#allocation2_spill] sm:$0xff] }
 0x194   : > { %v2770_v53 = vsub.f32 %v2391_v45, %v992_v13  ;;  %v888_v60 = vpop.xlane.xlu0 %887  ;;  %v1262_v29 = vsel %vm756_vm0, %v1118_v0, 0.0 }
 0x195   : > { %3285 = vst [vmem:[#allocation16_spill] sm:$0xff] %v2766_v14  ;;  %v993_v47 = vmul.f32 0.125, %v888_v60  ;;  %v891_v41 = vpop.xlane.xlu1 %890  ;;  %1263 = vadd.xlane.f32.xlu1 %v1262_v29  ;;  %1260 = vadd.xlane.f32.xlu0 %v1259_v7  ;;  %v1119_v20 = vmul.f32 %v2766_v14, %v2766_v14 }
 0x196   : > { %v994_v34 = vmul.f32 0.125, %v891_v41  ;;  %v1120_v28 = vmul.f32 %v2770_v53, %v2770_v53 }
 0x197   : > { %v2778_v2 = vsub.f32 %v3286_v32, %v993_v47  ;;  %v1265_v45 = vsel %vm756_vm0, %v1119_v20, 0.0  ;;  %v3289_v32 = vld [vmem:[#allocation3_spill] sm:$0xff]  ;;  %v3291_v20 = vld [vmem:[#allocation4_spill] sm:$0xff] }
 0x198   : > { %v2782_v4 = vsub.f32 %v2403_v25, %v994_v34  ;;  %v894_v13 = vpop.xlane.xlu0 %893  ;;  %v1268_v0 = vsel %vm756_vm0, %v1120_v28, 0.0 }
 0x199   : > { %3287 = vst [vmem:[#allocation2_spill] sm:$0xff] %v2778_v2  ;;  %v995_v60 = vmul.f32 0.125, %v894_v13  ;;  %v897_v7 = vpop.xlane.xlu1 %896  ;;  %1269 = vadd.xlane.f32.xlu1 %v1268_v0  ;;  %1266 = vadd.xlane.f32.xlu0 %v1265_v45  ;;  %v1121_v29 = vmul.f32 %v2778_v2, %v2778_v2 }
 0x19a   : > { %3288 = vst [vmem:[#allocation17_spill] sm:$0xff] %v2782_v4  ;;  %v996_v41 = vmul.f32 0.125, %v897_v7  ;;  %v1122_v47 = vmul.f32 %v2782_v4, %v2782_v4 }
 0x19b   : > { %v2790_v14 = vsub.f32 %v3289_v32, %v995_v60  ;;  %v1271_v25 = vsel %vm756_vm0, %v1121_v29, 0.0  ;;  %v3292_v32 = vld [vmem:[#allocation5_spill] sm:$0xff] }
 0x19c   : > { %v2794_v34 = vsub.f32 %v3291_v20, %v996_v41  ;;  %v900_v28 = vpop.xlane.xlu0 %899  ;;  %v1274_v13 = vsel %vm756_vm0, %v1122_v47, 0.0 }
 0x19d   : > { %3290 = vst [vmem:[#allocation3_spill] sm:$0xff] %v2790_v14  ;;  %v997_v0 = vmul.f32 0.125, %v900_v28  ;;  %v903_v45 = vpop.xlane.xlu1 %902  ;;  %1275 = vadd.xlane.f32.xlu1 %v1274_v13  ;;  %1272 = vadd.xlane.f32.xlu0 %v1271_v25  ;;  %v1123_v7 = vmul.f32 %v2790_v14, %v2790_v14 }
 0x19e   : > { %v998_v2 = vmul.f32 0.125, %v903_v45  ;;  %v1124_v60 = vmul.f32 %v2794_v34, %v2794_v34 }
 0x19f   : > { %v2802_v4 = vsub.f32 %v3292_v32, %v997_v0  ;;  %v1277_v29 = vsel %vm756_vm0, %v1123_v7, 0.0  ;;  %v3294_v32 = vld [vmem:[#allocation6_spill] sm:$0xff] }
 0x1a0   : > { %v2806_v41 = vsub.f32 %v2427_v56, %v998_v2  ;;  %v906_v47 = vpop.xlane.xlu0 %905  ;;  %v1280_v20 = vsel %vm756_vm0, %v1124_v60, 0.0 }
 0x1a1   : > { %3293 = vst [vmem:[#allocation4_spill] sm:$0xff] %v2802_v4  ;;  %v999_v28 = vmul.f32 0.125, %v906_v47  ;;  %v909_v25 = vpop.xlane.xlu1 %908  ;;  %1281 = vadd.xlane.f32.xlu1 %v1280_v20  ;;  %1278 = vadd.xlane.f32.xlu0 %v1277_v29  ;;  %v1125_v13 = vmul.f32 %v2802_v4, %v2802_v4 }
 0x1a2   : > { %v1000_v45 = vmul.f32 0.125, %v909_v25  ;;  %v1126_v0 = vmul.f32 %v2806_v41, %v2806_v41 }
 0x1a3   : > { %v2814_v14 = vsub.f32 %v3294_v32, %v999_v28  ;;  %v1283_v56 = vsel %vm756_vm0, %v1125_v13, 0.0  ;;  %v3297_v32 = vld [vmem:[#allocation7_spill] sm:$0xff]  ;;  %v3299_v13 = vld [vmem:[#allocation8_spill] sm:$0xff] }
 0x1a4   : > { %v2818_v2 = vsub.f32 %v2439_v49, %v1000_v45  ;;  %v912_v7 = vpop.xlane.xlu0 %911  ;;  %v1286_v60 = vsel %vm756_vm0, %v1126_v0, 0.0 }
 0x1a5   : > { %3295 = vst [vmem:[#allocation5_spill] sm:$0xff] %v2814_v14  ;;  %v1001_v47 = vmul.f32 0.125, %v912_v7  ;;  %v915_v29 = vpop.xlane.xlu1 %914  ;;  %1287 = vadd.xlane.f32.xlu1 %v1286_v60  ;;  %1284 = vadd.xlane.f32.xlu0 %v1283_v56  ;;  %v1127_v20 = vmul.f32 %v2814_v14, %v2814_v14 }
 0x1a6   : > { %3296 = vst [vmem:[#allocation6_spill] sm:$0xff] %v2818_v2  ;;  %v1002_v25 = vmul.f32 0.125, %v915_v29  ;;  %v1128_v28 = vmul.f32 %v2818_v2, %v2818_v2 }
 0x1a7   : > { %v2826_v4 = vsub.f32 %v3297_v32, %v1001_v47  ;;  %v1289_v49 = vsel %vm756_vm0, %v1127_v20, 0.0  ;;  %v3300_v32 = vld [vmem:[#allocation9_spill] sm:$0xff] }
 0x1a8   : > { %v2830_v45 = vsub.f32 %v3299_v13, %v1002_v25  ;;  %v918_v0 = vpop.xlane.xlu0 %917  ;;  %v1292_v7 = vsel %vm756_vm0, %v1128_v28, 0.0 }
 0x1a9   : > { %3298 = vst [vmem:[#allocation7_spill] sm:$0xff] %v2826_v4  ;;  %v1003_v60 = vmul.f32 0.125, %v918_v0  ;;  %v921_v56 = vpop.xlane.xlu1 %920  ;;  %1293 = vadd.xlane.f32.xlu1 %v1292_v7  ;;  %1290 = vadd.xlane.f32.xlu0 %v1289_v49  ;;  %v1129_v29 = vmul.f32 %v2826_v4, %v2826_v4 }
 0x1aa   : > { %v1004_v14 = vmul.f32 0.125, %v921_v56  ;;  %v1130_v47 = vmul.f32 %v2830_v45, %v2830_v45 }
 0x1ab   : > { %v2838_v2 = vsub.f32 %v3300_v32, %v1003_v60  ;;  %v1295_v20 = vsel %vm756_vm0, %v1129_v29, 0.0  ;;  %v3302_v32 = vld [vmem:[#allocation10_spill] sm:$0xff] }
 0x1ac   : > { %v2842_v25 = vsub.f32 %v2463_v18, %v1004_v14  ;;  %v924_v28 = vpop.xlane.xlu0 %923  ;;  %v1298_v13 = vsel %vm756_vm0, %v1130_v47, 0.0 }
 0x1ad   : > { %3301 = vst [vmem:[#allocation8_spill] sm:$0xff] %v2838_v2  ;;  %v1005_v0 = vmul.f32 0.125, %v924_v28  ;;  %v927_v49 = vpop.xlane.xlu1 %926  ;;  %1299 = vadd.xlane.f32.xlu1 %v1298_v13  ;;  %1296 = vadd.xlane.f32.xlu0 %v1295_v20  ;;  %v1131_v7 = vmul.f32 %v2838_v2, %v2838_v2 }
 0x1ae   : > { %v1006_v56 = vmul.f32 0.125, %v927_v49  ;;  %v1132_v60 = vmul.f32 %v2842_v25, %v2842_v25 }
 0x1af   : > { %v2850_v4 = vsub.f32 %v3302_v32, %v1005_v0  ;;  %v1301_v18 = vsel %vm756_vm0, %v1131_v7, 0.0  ;;  %v3304_v32 = vld [vmem:[#allocation11_spill] sm:$0xff] }
 0x1b0   : > { %v2854_v14 = vsub.f32 %v2475_v31, %v1006_v56  ;;  %v930_v29 = vpop.xlane.xlu0 %929  ;;  %v1304_v47 = vsel %vm756_vm0, %v1132_v60, 0.0 }
 0x1b1   : > { %3303 = vst [vmem:[#allocation9_spill] sm:$0xff] %v2850_v4  ;;  %v1007_v28 = vmul.f32 0.125, %v930_v29  ;;  %v933_v20 = vpop.xlane.xlu1 %932  ;;  %1305 = vadd.xlane.f32.xlu1 %v1304_v47  ;;  %1302 = vadd.xlane.f32.xlu0 %v1301_v18  ;;  %v1133_v13 = vmul.f32 %v2850_v4, %v2850_v4 }
 0x1b2   : > { %v1008_v49 = vmul.f32 0.125, %v933_v20  ;;  %v1134_v0 = vmul.f32 %v2854_v14, %v2854_v14 }
 0x1b3   : > { %v2862_v2 = vsub.f32 %v3304_v32, %v1007_v28  ;;  %v1307_v31 = vsel %vm756_vm0, %v1133_v13, 0.0 }
 0x1b4   : > { %v2866_v7 = vsub.f32 %v2487_v11, %v1008_v49  ;;  %v936_v56 = vpop.xlane.xlu0 %935  ;;  %v1310_v60 = vsel %vm756_vm0, %v1134_v0, 0.0 }
 0x1b5   : > { %3305 = vst [vmem:[#allocation10_spill] sm:$0xff] %v2862_v2  ;;  %v1009_v29 = vmul.f32 0.125, %v936_v56  ;;  %v939_v18 = vpop.xlane.xlu1 %938  ;;  %1311 = vadd.xlane.f32.xlu1 %v1310_v60  ;;  %1308 = vadd.xlane.f32.xlu0 %v1307_v31  ;;  %v1135_v47 = vmul.f32 %v2862_v2, %v2862_v2 }
 0x1b6   : > { %3306 = vst [vmem:[#allocation11_spill] sm:$0xff] %v2866_v7  ;;  %v1010_v20 = vmul.f32 0.125, %v939_v18  ;;  %v1136_v28 = vmul.f32 %v2866_v7, %v2866_v7 }
 0x1b7   : > { %v2874_v32 = vsub.f32 %v2493_v42, %v1009_v29  ;;  %v1313_v11 = vsel %vm756_vm0, %v1135_v47, 0.0  ;;  %v3309_v29 = vld [vmem:[#allocation12_spill] sm:$0xff] }
 0x1b8   : > { %v2878_v13 = vsub.f32 %v2499_v57, %v1010_v20  ;;  %v942_v49 = vpop.xlane.xlu0 %941  ;;  %v1316_v0 = vsel %vm756_vm0, %v1136_v28, 0.0 }
 0x1b9   : > { %3307 = vst [vmem:[#allocation18_spill] sm:$0xff] %v2874_v32  ;;  %v1011_v56 = vmul.f32 0.125, %v942_v49  ;;  %v945_v31 = vpop.xlane.xlu1 %944  ;;  %1317 = vadd.xlane.f32.xlu1 %v1316_v0  ;;  %1314 = vadd.xlane.f32.xlu0 %v1313_v11  ;;  %v1137_v60 = vmul.f32 %v2874_v32, %v2874_v32 }
 0x1ba   : > { %3308 = vst [vmem:[#allocation19_spill] sm:$0xff] %v2878_v13  ;;  %v1012_v18 = vmul.f32 0.125, %v945_v31  ;;  %v1138_v42 = vmul.f32 %v2878_v13, %v2878_v13  ;;  %v3312_v31 = vld [vmem:[#allocation13_spill] sm:$0xff] }
 0x1bb   : > { %v2886_v2 = vsub.f32 %v3309_v29, %v1011_v56  ;;  %v1319_v57 = vsel %vm756_vm0, %v1137_v60, 0.0 }
 0x1bc   : > { %v2890_v47 = vsub.f32 %v2510_v8, %v1012_v18  ;;  %v948_v20 = vpop.xlane.xlu0 %947  ;;  %v1322_v28 = vsel %vm756_vm0, %v1138_v42, 0.0 }
 0x1bd   : > { %3310 = vst [vmem:[#allocation12_spill] sm:$0xff] %v2886_v2  ;;  %v1013_v49 = vmul.f32 0.125, %v948_v20  ;;  %1323 = vadd.xlane.f32.xlu1 %v1322_v28  ;;  %1320 = vadd.xlane.f32.xlu0 %v1319_v57  ;;  %v1139_v11 = vmul.f32 %v2886_v2, %v2886_v2 }
 0x1be   : > { %3311 = vst [vmem:[#allocation20_spill] sm:$0xff] %v2890_v47  ;;  %v1140_v0 = vmul.f32 %v2890_v47, %v2890_v47 }
 0x1bf   : > { %v2898_v56 = vsub.f32 %v3312_v31, %v1013_v49  ;;  %v1325_v60 = vsel %vm756_vm0, %v1139_v11, 0.0 }
 0x1c0   : > { %v1328_v8 = vsel %vm756_vm0, %v1140_v0, 0.0 }
 0x1c1   : > { %3313 = vst [vmem:[#allocation13_spill] sm:$0xff] %v2898_v56  ;;  %1329 = vadd.xlane.f32.xlu1 %v1328_v8  ;;  %1326 = vadd.xlane.f32.xlu0 %v1325_v60  ;;  %v1141_v18 = vmul.f32 %v2898_v56, %v2898_v56 }
 0x1c3   : > { %v1331_v42 = vsel %vm756_vm0, %v1141_v18, 0.0 }
 0x1c5   : > { %1332 = vadd.xlane.f32.xlu0 %v1331_v42 }
 0x1d1   : > { %v1144_v29 = vpop.xlane.xlu1 %1143 }
 0x1d2   : > { %v1334_v57 = vmul.f32 0.125, %v1144_v29 }
 0x1d4   : > { %v1398_v20 = vadd.f32 1e-06, %v1334_v57 }
 0x1d5   : > { %v1150_v28 = vpop.xlane.xlu1 %1149 }
 0x1d6   : > { %1876 = vrsqrt.f32 %v1398_v20  ;;  %v1336_v2 = vmul.f32 0.125, %v1150_v28  ;;  %v1147_v49 = vpop.xlane.xlu0 %1146 }
 0x1d7   : > { %v1335_v31 = vmul.f32 0.125, %v1147_v49 }
 0x1d8   : > { %v1400_v47 = vadd.f32 1e-06, %v1336_v2  ;;  %v2908_v2 = vld [vmem:[%s3237_s3] ss:$0 sm:$0xff] }
 0x1d9   : > { %v1399_v11 = vadd.f32 1e-06, %v1335_v31 }
 0x1da   : > { %1878 = vrsqrt.f32 %v1400_v47  ;;  %v1156_v0 = vpop.xlane.xlu1 %1155  ;;  %v1153_v8 = vpop.xlane.xlu0 %1152  ;;  %v3314_v47 = vld [vmem:[#allocation14_spill] sm:$0xff] }
 0x1db   : > { %1880 = vrsqrt.f32 %v1399_v11  ;;  %v1338_v60 = vmul.f32 0.125, %v1156_v0  ;;  %v1337_v32 = vmul.f32 0.125, %v1153_v8 }
 0x1dd   : > { %v1402_v56 = vadd.f32 1e-06, %v1338_v60  ;;  %v1401_v13 = vadd.f32 1e-06, %v1337_v32  ;;  %v2914_v32 = vld [vmem:[%s3238_s4] ss:$0 sm:$0xff] }
 0x1de   : > { %v1162_v18 = vpop.xlane.xlu1 %1161  ;;  %v1159_v42 = vpop.xlane.xlu0 %1158 }
 0x1df   : > { %1882 = vrsqrt.f32 %v1402_v56  ;;  %v1340_v29 = vmul.f32 0.125, %v1162_v18  ;;  %v1339_v57 = vmul.f32 0.125, %v1159_v42 }
 0x1e0   : > { %v1877_v20 = vpop.eup %1876  ;;  %1884 = vrsqrt.f32 %v1401_v13 }
 0x1e1   : > { %v1526_v28 = vmul.f32 %v1877_v20, %v3314_v47  ;;  %v1404_v49 = vadd.f32 1e-06, %v1340_v29  ;;  %v1403_v31 = vadd.f32 1e-06, %v1339_v57 }
 0x1e2   : > { %v1168_v56 = vpop.xlane.xlu1 %1167  ;;  %v1165_v11 = vpop.xlane.xlu0 %1164 }
 0x1e3   : > { %v1596_v0 = vmul.f32 %v2908_v2, %v1526_v28  ;;  %1886 = vrsqrt.f32 %v1404_v49  ;;  %v1342_v8 = vmul.f32 0.125, %v1168_v56  ;;  %v1341_v60 = vmul.f32 0.125, %v1165_v11 }
 0x1e4   : > { %v1879_v18 = vpop.eup %1878  ;;  %1888 = vrsqrt.f32 %v1403_v31 }
 0x1e5   : > { %v1881_v13 = vpop.eup %1880  ;;  %v1666_v42 = vadd.f32 %v2914_v32, %v1596_v0  ;;  %v1528_v29 = vmul.f32 %v1879_v18, %v2527_v63  ;;  %v1406_v57 = vadd.f32 1e-06, %v1342_v8  ;;  %v1405_v20 = vadd.f32 1e-06, %v1341_v60 }
 0x1e6   : > { %v1527_v47 = vmul.f32 %v1881_v13, %v2531_v19  ;;  %v1174_v28 = vpop.xlane.xlu1 %1173  ;;  %v1171_v49 = vpop.xlane.xlu0 %1170 }
 0x1e7   : > { %1730 = vst.msk [vmem:[%s2922_s10] sm:$0xff] %vm756_vm0, %v1666_v42  ;;  %v1598_v56 = vmul.f32 %v2908_v2, %v1528_v29  ;;  %1890 = vrsqrt.f32 %v1406_v57  ;;  %v1344_v11 = vmul.f32 0.125, %v1174_v28  ;;  %v1343_v7 = vmul.f32 0.125, %v1171_v49 }
 0x1e8   : > { %v1597_v31 = vmul.f32 %v2908_v2, %v1527_v47  ;;  %1892 = vrsqrt.f32 %v1405_v20 }
 0x1e9   : > { %v1883_v0 = vpop.eup %1882  ;;  %v1668_v63 = vadd.f32 %v2914_v32, %v1598_v56  ;;  %v1408_v8 = vadd.f32 1e-06, %v1344_v11  ;;  %v1407_v60 = vadd.f32 1e-06, %v1343_v7 }
 0x1ea   : > { %v1885_v19 = vpop.eup %1884  ;;  %v1667_v18 = vadd.f32 %v2914_v32, %v1597_v31  ;;  %v1530_v13 = vmul.f32 %v1883_v0, %v2542_v50  ;;  %v1180_v42 = vpop.xlane.xlu1 %1179 }
 0x1eb   : > { %v1177_v4 = vpop.xlane.xlu0 %1176  ;;  %1732 = vst.msk [vmem:[%s2922_s10 + $0x10] sm:$0xff] %vm756_vm0, %v1668_v63  ;;  %v1529_v29 = vmul.f32 %v1885_v19, %v2538_v1  ;;  %1894 = vrsqrt.f32 %v1408_v8  ;;  %v1346_v57 = vmul.f32 0.125, %v1180_v42 }
 0x1ec   : > { %v1345_v47 = vmul.f32 0.125, %v1177_v4  ;;  %1731 = vst.msk [vmem:[%s2922_s10 + $0x8] sm:$0xff] %vm756_vm0, %v1667_v18  ;;  %v1600_v20 = vmul.f32 %v2908_v2, %v1530_v13  ;;  %1896 = vrsqrt.f32 %v1407_v60 }
 0x1ed   : > { %v1887_v7 = vpop.eup %1886  ;;  %v1599_v28 = vmul.f32 %v2908_v2, %v1529_v29  ;;  %v1410_v49 = vadd.f32 1e-06, %v1346_v57 }
 0x1ee   : > { %v1409_v50 = vadd.f32 1e-06, %v1345_v47  ;;  %v1889_v56 = vpop.eup %1888  ;;  %v1670_v11 = vadd.f32 %v2914_v32, %v1600_v20  ;;  %v1532_v1 = vmul.f32 %v1887_v7, %v2554_v24  ;;  %v1186_v31 = vpop.xlane.xlu1 %1185 }
 0x1ef   : > { %v1183_v0 = vpop.xlane.xlu0 %1182  ;;  %v1669_v4 = vadd.f32 %v2914_v32, %v1599_v28  ;;  %v1531_v63 = vmul.f32 %v1889_v56, %v2550_v39  ;;  %1898 = vrsqrt.f32 %v1410_v49  ;;  %v1348_v8 = vmul.f32 0.125, %v1186_v31 }
 0x1f0   : > { %1734 = vst.msk [vmem:[%s2922_s10 + $0x20] sm:$0xff] %vm756_vm0, %v1670_v11  ;;  %v1602_v60 = vmul.f32 %v2908_v2, %v1532_v1  ;;  %1900 = vrsqrt.f32 %v1409_v50  ;;  %v1347_v19 = vmul.f32 0.125, %v1183_v0 }
 0x1f1   : > { %v1891_v18 = vpop.eup %1890  ;;  %1733 = vst.msk [vmem:[%s2922_s10 + $0x18] sm:$0xff] %vm756_vm0, %v1669_v4  ;;  %v1601_v24 = vmul.f32 %v2908_v2, %v1531_v63  ;;  %v1412_v13 = vadd.f32 1e-06, %v1348_v8 }
 0x1f2   : > { %v1893_v42 = vpop.eup %1892  ;;  %v1672_v29 = vadd.f32 %v2914_v32, %v1602_v60  ;;  %v1534_v39 = vmul.f32 %v1891_v18, %v2566_v52  ;;  %v1411_v57 = vadd.f32 1e-06, %v1347_v19  ;;  %v1192_v47 = vpop.xlane.xlu1 %1191 }
 0x1f3   : > { %v1189_v20 = vpop.xlane.xlu0 %1188  ;;  %v1671_v7 = vadd.f32 %v2914_v32, %v1601_v24  ;;  %v1533_v28 = vmul.f32 %v1893_v42, %v2562_v10  ;;  %1902 = vrsqrt.f32 %v1412_v13  ;;  %v1350_v49 = vmul.f32 0.125, %v1192_v47 }
 0x1f4   : > { %1736 = vst.msk [vmem:[%s2922_s10 + $0x30] sm:$0xff] %vm756_vm0, %v1672_v29  ;;  %v1604_v50 = vmul.f32 %v2908_v2, %v1534_v39  ;;  %1904 = vrsqrt.f32 %v1411_v57  ;;  %v1349_v56 = vmul.f32 0.125, %v1189_v20 }
 0x1f5   : > { %v1895_v11 = vpop.eup %1894  ;;  %1735 = vst.msk [vmem:[%s2922_s10 + $0x28] sm:$0xff] %vm756_vm0, %v1671_v7  ;;  %v1603_v52 = vmul.f32 %v2908_v2, %v1533_v28  ;;  %v1414_v1 = vadd.f32 1e-06, %v1350_v49 }
 0x1f6   : > { %v1897_v31 = vpop.eup %1896  ;;  %v1674_v0 = vadd.f32 %v2914_v32, %v1604_v50  ;;  %v1536_v10 = vmul.f32 %v1895_v11, %v2578_v15  ;;  %v1413_v4 = vadd.f32 1e-06, %v1349_v56  ;;  %v1198_v63 = vpop.xlane.xlu1 %1197 }
 0x1f7   : > { %v1195_v8 = vpop.xlane.xlu0 %1194  ;;  %v1673_v60 = vadd.f32 %v2914_v32, %v1603_v52  ;;  %v1535_v19 = vmul.f32 %v1897_v31, %v2574_v23  ;;  %1906 = vrsqrt.f32 %v1414_v1  ;;  %v1352_v18 = vmul.f32 0.125, %v1198_v63 }
 0x1f8   : > { %1738 = vst.msk [vmem:[%s2922_s10 + $0x40] sm:$0xff] %vm756_vm0, %v1674_v0  ;;  %v1606_v24 = vmul.f32 %v2908_v2, %v1536_v10  ;;  %1908 = vrsqrt.f32 %v1413_v4  ;;  %v1351_v13 = vmul.f32 0.125, %v1195_v8 }
 0x1f9   : > { %v1899_v42 = vpop.eup %1898  ;;  %1737 = vst.msk [vmem:[%s2922_s10 + $0x38] sm:$0xff] %vm756_vm0, %v1673_v60  ;;  %v1605_v15 = vmul.f32 %v2908_v2, %v1535_v19  ;;  %v1416_v29 = vadd.f32 1e-06, %v1352_v18 }
 0x1fa   : > { %v1901_v39 = vpop.eup %1900  ;;  %v1676_v57 = vadd.f32 %v2914_v32, %v1606_v24  ;;  %v1538_v23 = vmul.f32 %v1899_v42, %v2590_v61  ;;  %v1415_v47 = vadd.f32 1e-06, %v1351_v13  ;;  %v1204_v20 = vpop.xlane.xlu1 %1203 }
 0x1fb   : > { %v1201_v7 = vpop.xlane.xlu0 %1200  ;;  %v1675_v28 = vadd.f32 %v2914_v32, %v1605_v15  ;;  %v1537_v49 = vmul.f32 %v1901_v39, %v2586_v40  ;;  %1910 = vrsqrt.f32 %v1416_v29  ;;  %v1354_v50 = vmul.f32 0.125, %v1204_v20 }
 0x1fc   : > { %1740 = vst.msk [vmem:[%s2922_s10 + $0x50] sm:$0xff] %vm756_vm0, %v1676_v57  ;;  %v1608_v56 = vmul.f32 %v2908_v2, %v1538_v23  ;;  %1912 = vrsqrt.f32 %v1415_v47  ;;  %v1353_v11 = vmul.f32 0.125, %v1201_v7 }
 0x1fd   : > { %v1903_v52 = vpop.eup %1902  ;;  %1739 = vst.msk [vmem:[%s2922_s10 + $0x48] sm:$0xff] %vm756_vm0, %v1675_v28  ;;  %v1607_v61 = vmul.f32 %v2908_v2, %v1537_v49  ;;  %v1418_v1 = vadd.f32 1e-06, %v1354_v50 }
 0x1fe   : > { %v1905_v31 = vpop.eup %1904  ;;  %v1678_v0 = vadd.f32 %v2914_v32, %v1608_v56  ;;  %v1540_v40 = vmul.f32 %v1903_v52, %v2602_v30  ;;  %v1417_v10 = vadd.f32 1e-06, %v1353_v11  ;;  %v1210_v4 = vpop.xlane.xlu1 %1209 }
 0x1ff   : > { %v1207_v63 = vpop.xlane.xlu0 %1206  ;;  %v1677_v8 = vadd.f32 %v2914_v32, %v1607_v61  ;;  %v1539_v60 = vmul.f32 %v1905_v31, %v2598_v17  ;;  %1914 = vrsqrt.f32 %v1418_v1  ;;  %v1356_v19 = vmul.f32 0.125, %v1210_v4 }
 0x200   : > { %1742 = vst.msk [vmem:[%s2922_s10 + $0x60] sm:$0xff] %vm756_vm0, %v1678_v0  ;;  %v1610_v18 = vmul.f32 %v2908_v2, %v1540_v40  ;;  %1916 = vrsqrt.f32 %v1417_v10  ;;  %v1355_v24 = vmul.f32 0.125, %v1207_v63 }
 0x201   : > { %v1907_v13 = vpop.eup %1906  ;;  %1741 = vst.msk [vmem:[%s2922_s10 + $0x58] sm:$0xff] %vm756_vm0, %v1677_v8  ;;  %v1609_v30 = vmul.f32 %v2908_v2, %v1539_v60  ;;  %v1420_v42 = vadd.f32 1e-06, %v1356_v19 }
 0x202   : > { %v1909_v15 = vpop.eup %1908  ;;  %v1680_v29 = vadd.f32 %v2914_v32, %v1610_v18  ;;  %v1542_v17 = vmul.f32 %v1907_v13, %v2614_v38  ;;  %v1419_v39 = vadd.f32 1e-06, %v1355_v24  ;;  %v1216_v57 = vpop.xlane.xlu1 %1215 }
 0x203   : > { %v1213_v23 = vpop.xlane.xlu0 %1212  ;;  %v1679_v47 = vadd.f32 %v2914_v32, %v1609_v30  ;;  %v1541_v20 = vmul.f32 %v1909_v15, %v2610_v9  ;;  %1918 = vrsqrt.f32 %v1420_v42  ;;  %v1358_v7 = vmul.f32 0.125, %v1216_v57 }
 0x204   : > { %1744 = vst.msk [vmem:[%s2922_s10 + $0x70] sm:$0xff] %vm756_vm0, %v1680_v29  ;;  %v1612_v28 = vmul.f32 %v2908_v2, %v1542_v17  ;;  %1920 = vrsqrt.f32 %v1419_v39  ;;  %v1357_v49 = vmul.f32 0.125, %v1213_v23 }
 0x205   : > { %v1911_v50 = vpop.eup %1910  ;;  %1743 = vst.msk [vmem:[%s2922_s10 + $0x68] sm:$0xff] %vm756_vm0, %v1679_v47  ;;  %v1611_v38 = vmul.f32 %v2908_v2, %v1541_v20  ;;  %v1422_v56 = vadd.f32 1e-06, %v1358_v7 }
 0x206   : > { %v1913_v11 = vpop.eup %1912  ;;  %v1682_v52 = vadd.f32 %v2914_v32, %v1612_v28  ;;  %v1544_v9 = vmul.f32 %v1911_v50, %v2626_v46  ;;  %v1421_v61 = vadd.f32 1e-06, %v1357_v49  ;;  %v1222_v1 = vpop.xlane.xlu1 %1221 }
 0x207   : > { %v1219_v31 = vpop.xlane.xlu0 %1218  ;;  %v1681_v0 = vadd.f32 %v2914_v32, %v1611_v38  ;;  %v1543_v40 = vmul.f32 %v1913_v11, %v2622_v27  ;;  %1922 = vrsqrt.f32 %v1422_v56  ;;  %v1360_v10 = vmul.f32 0.125, %v1222_v1 }
 0x208   : > { %1746 = vst.msk [vmem:[%s2922_s10 + $0x80] sm:$0xff] %vm756_vm0, %v1682_v52  ;;  %v1614_v4 = vmul.f32 %v2908_v2, %v1544_v9  ;;  %1924 = vrsqrt.f32 %v1421_v61  ;;  %v1359_v63 = vmul.f32 0.125, %v1219_v31 }
 0x209   : > { %v1915_v8 = vpop.eup %1914  ;;  %1745 = vst.msk [vmem:[%s2922_s10 + $0x78] sm:$0xff] %vm756_vm0, %v1681_v0  ;;  %v1613_v46 = vmul.f32 %v2908_v2, %v1543_v40  ;;  %v1424_v60 = vadd.f32 1e-06, %v1360_v10 }
 0x20a   : > { %v1917_v19 = vpop.eup %1916  ;;  %v1684_v18 = vadd.f32 %v2914_v32, %v1614_v4  ;;  %v1546_v27 = vmul.f32 %v1915_v8, %v2638_v54  ;;  %v1423_v24 = vadd.f32 1e-06, %v1359_v63  ;;  %v1228_v13 = vpop.xlane.xlu1 %1227 }
 0x20b   : > { %v1225_v30 = vpop.xlane.xlu0 %1224  ;;  %v1683_v42 = vadd.f32 %v2914_v32, %v1613_v46  ;;  %v1545_v15 = vmul.f32 %v1917_v19, %v2634_v35  ;;  %1926 = vrsqrt.f32 %v1424_v60  ;;  %v1362_v29 = vmul.f32 0.125, %v1228_v13 }
 0x20c   : > { %1748 = vst.msk [vmem:[%s2922_s10 + $0x90] sm:$0xff] %vm756_vm0, %v1684_v18  ;;  %v1616_v17 = vmul.f32 %v2908_v2, %v1546_v27  ;;  %1928 = vrsqrt.f32 %v1423_v24  ;;  %v1361_v39 = vmul.f32 0.125, %v1225_v30 }
 0x20d   : > { %v1919_v57 = vpop.eup %1918  ;;  %1747 = vst.msk [vmem:[%s2922_s10 + $0x88] sm:$0xff] %vm756_vm0, %v1683_v42  ;;  %v1615_v54 = vmul.f32 %v2908_v2, %v1545_v15  ;;  %v1426_v23 = vadd.f32 1e-06, %v1362_v29 }
 0x20e   : > { %v1921_v47 = vpop.eup %1920  ;;  %v1686_v20 = vadd.f32 %v2914_v32, %v1616_v17  ;;  %v1548_v35 = vmul.f32 %v1919_v57, %v2650_v62  ;;  %v1425_v7 = vadd.f32 1e-06, %v1361_v39  ;;  %v1234_v28 = vpop.xlane.xlu1 %1233 }
 0x20f   : > { %v1231_v49 = vpop.xlane.xlu0 %1230  ;;  %v1685_v50 = vadd.f32 %v2914_v32, %v1615_v54  ;;  %v1547_v38 = vmul.f32 %v1921_v47, %v2646_v43  ;;  %1930 = vrsqrt.f32 %v1426_v23  ;;  %v1364_v56 = vmul.f32 0.125, %v1234_v28 }
 0x210   : > { %1750 = vst.msk [vmem:[%s2922_s10 + $0xa0] sm:$0xff] %vm756_vm0, %v1686_v20  ;;  %v1618_v11 = vmul.f32 %v2908_v2, %v1548_v35  ;;  %1932 = vrsqrt.f32 %v1425_v7  ;;  %v1363_v52 = vmul.f32 0.125, %v1231_v49 }
 0x211   : > { %v1923_v9 = vpop.eup %1922  ;;  %1749 = vst.msk [vmem:[%s2922_s10 + $0x98] sm:$0xff] %vm756_vm0, %v1685_v50  ;;  %v1617_v62 = vmul.f32 %v2908_v2, %v1547_v38  ;;  %v1428_v61 = vadd.f32 1e-06, %v1364_v56 }
 0x212   : > { %v1925_v1 = vpop.eup %1924  ;;  %v1688_v31 = vadd.f32 %v2914_v32, %v1618_v11  ;;  %v1550_v43 = vmul.f32 %v1923_v9, %v2662_v6  ;;  %v1427_v0 = vadd.f32 1e-06, %v1363_v52  ;;  %v1240_v40 = vpop.xlane.xlu1 %1239 }
 0x213   : > { %v1237_v10 = vpop.xlane.xlu0 %1236  ;;  %v1687_v4 = vadd.f32 %v2914_v32, %v1617_v62  ;;  %v1549_v63 = vmul.f32 %v1925_v1, %v2658_v51  ;;  %1934 = vrsqrt.f32 %v1428_v61  ;;  %v1366_v8 = vmul.f32 0.125, %v1240_v40 }
 0x214   : > { %1752 = vst.msk [vmem:[%s2922_s10 + $0xb0] sm:$0xff] %vm756_vm0, %v1688_v31  ;;  %v1620_v46 = vmul.f32 %v2908_v2, %v1550_v43  ;;  %1936 = vrsqrt.f32 %v1427_v0  ;;  %v1365_v60 = vmul.f32 0.125, %v1237_v10 }
 0x215   : > { %v1927_v19 = vpop.eup %1926  ;;  %1751 = vst.msk [vmem:[%s2922_s10 + $0xa8] sm:$0xff] %vm756_vm0, %v1687_v4  ;;  %v1619_v6 = vmul.f32 %v2908_v2, %v1549_v63  ;;  %v1430_v18 = vadd.f32 1e-06, %v1366_v8 }
 0x216   : > { %v1929_v27 = vpop.eup %1928  ;;  %v1690_v24 = vadd.f32 %v2914_v32, %v1620_v46  ;;  %v1552_v51 = vmul.f32 %v1927_v19, %v2674_v16  ;;  %v1429_v13 = vadd.f32 1e-06, %v1365_v60  ;;  %v1246_v30 = vpop.xlane.xlu1 %1245 }
 0x217   : > { %v1243_v42 = vpop.xlane.xlu0 %1242  ;;  %v1689_v15 = vadd.f32 %v2914_v32, %v1619_v6  ;;  %v1551_v29 = vmul.f32 %v1929_v27, %v2670_v59  ;;  %1938 = vrsqrt.f32 %v1430_v18  ;;  %v1368_v17 = vmul.f32 0.125, %v1246_v30 }
 0x218   : > { %1754 = vst.msk [vmem:[%s2922_s10 + $0xc0] sm:$0xff] %vm756_vm0, %v1690_v24  ;;  %v1622_v39 = vmul.f32 %v2908_v2, %v1552_v51  ;;  %1940 = vrsqrt.f32 %v1429_v13  ;;  %v1367_v57 = vmul.f32 0.125, %v1243_v42 }
 0x219   : > { %v1931_v54 = vpop.eup %1930  ;;  %1753 = vst.msk [vmem:[%s2922_s10 + $0xb8] sm:$0xff] %vm756_vm0, %v1689_v15  ;;  %v1621_v16 = vmul.f32 %v2908_v2, %v1551_v29  ;;  %v1432_v23 = vadd.f32 1e-06, %v1368_v17 }
 0x21a   : > { %v1933_v47 = vpop.eup %1932  ;;  %v1692_v20 = vadd.f32 %v2914_v32, %v1622_v39  ;;  %v1554_v59 = vmul.f32 %v1931_v54, %v2686_v26  ;;  %v1431_v35 = vadd.f32 1e-06, %v1367_v57  ;;  %v1252_v7 = vpop.xlane.xlu1 %1251 }
 0x21b   : > { %v1249_v28 = vpop.xlane.xlu0 %1248  ;;  %v1691_v49 = vadd.f32 %v2914_v32, %v1621_v16  ;;  %v1553_v50 = vmul.f32 %v1933_v47, %v2682_v3  ;;  %1942 = vrsqrt.f32 %v1432_v23  ;;  %v1370_v38 = vmul.f32 0.125, %v1252_v7 }
 0x21c   : > { %1756 = vst.msk [vmem:[%s2922_s10 + $0xd0] sm:$0xff] %vm756_vm0, %v1692_v20  ;;  %v1624_v56 = vmul.f32 %v2908_v2, %v1554_v59  ;;  %1944 = vrsqrt.f32 %v1431_v35  ;;  %v1369_v11 = vmul.f32 0.125, %v1249_v28 }
 0x21d   : > { %v1935_v52 = vpop.eup %1934  ;;  %1755 = vst.msk [vmem:[%s2922_s10 + $0xc8] sm:$0xff] %vm756_vm0, %v1691_v49  ;;  %v1623_v26 = vmul.f32 %v2908_v2, %v1553_v50  ;;  %v1434_v9 = vadd.f32 1e-06, %v1370_v38 }
 0x21e   : > { %v1937_v62 = vpop.eup %1936  ;;  %v1694_v61 = vadd.f32 %v2914_v32, %v1624_v56  ;;  %v1556_v3 = vmul.f32 %v1935_v52, %v2698_v37  ;;  %v1433_v1 = vadd.f32 1e-06, %v1369_v11  ;;  %v1258_v31 = vpop.xlane.xlu1 %1257 }
 0x21f   : > { %v1255_v43 = vpop.xlane.xlu0 %1254  ;;  %v1693_v0 = vadd.f32 %v2914_v32, %v1623_v26  ;;  %v1555_v40 = vmul.f32 %v1937_v62, %v2694_v12  ;;  %1946 = vrsqrt.f32 %v1434_v9  ;;  %v1372_v10 = vmul.f32 0.125, %v1258_v31 }
 0x220   : > { %1758 = vst.msk [vmem:[%s2922_s10 + $0xe0] sm:$0xff] %vm756_vm0, %v1694_v61  ;;  %v1626_v4 = vmul.f32 %v2908_v2, %v1556_v3  ;;  %1948 = vrsqrt.f32 %v1433_v1  ;;  %v1371_v63 = vmul.f32 0.125, %v1255_v43 }
 0x221   : > { %v1939_v8 = vpop.eup %1938  ;;  %1757 = vst.msk [vmem:[%s2922_s10 + $0xd8] sm:$0xff] %vm756_vm0, %v1693_v0  ;;  %v1625_v37 = vmul.f32 %v2908_v2, %v1555_v40  ;;  %v1436_v46 = vadd.f32 1e-06, %v1372_v10 }
 0x222   : > { %v1941_v60 = vpop.eup %1940  ;;  %v1696_v19 = vadd.f32 %v2914_v32, %v1626_v4  ;;  %v1558_v12 = vmul.f32 %v1939_v8, %v2710_v48  ;;  %v1435_v6 = vadd.f32 1e-06, %v1371_v63  ;;  %v1264_v18 = vpop.xlane.xlu1 %1263 }
 0x223   : > { %v1261_v27 = vpop.xlane.xlu0 %1260  ;;  %v1695_v24 = vadd.f32 %v2914_v32, %v1625_v37  ;;  %v1557_v51 = vmul.f32 %v1941_v60, %v2706_v22  ;;  %1950 = vrsqrt.f32 %v1436_v46  ;;  %v1374_v13 = vmul.f32 0.125, %v1264_v18 }
 0x224   : > { %1760 = vst.msk [vmem:[%s2922_s10 + $0xf0] sm:$0xff] %vm756_vm0, %v1696_v19  ;;  %v1628_v30 = vmul.f32 %v2908_v2, %v1558_v12  ;;  %1952 = vrsqrt.f32 %v1435_v6  ;;  %v1373_v42 = vmul.f32 0.125, %v1261_v27 }
 0x225   : > { %v1943_v15 = vpop.eup %1942  ;;  %1759 = vst.msk [vmem:[%s2922_s10 + $0xe8] sm:$0xff] %vm756_vm0, %v1695_v24  ;;  %v1627_v48 = vmul.f32 %v2908_v2, %v1557_v51  ;;  %v1438_v29 = vadd.f32 1e-06, %v1374_v13  ;;  %v3315_v13 = vld [vmem:[#allocation15_spill] sm:$0xff] }
 0x226   : > { %v1945_v17 = vpop.eup %1944  ;;  %v1698_v39 = vadd.f32 %v2914_v32, %v1628_v30  ;;  %v1560_v22 = vmul.f32 %v1943_v15, %v2722_v58  ;;  %v1437_v57 = vadd.f32 1e-06, %v1373_v42  ;;  %v1270_v54 = vpop.xlane.xlu1 %1269 }
 0x227   : > { %v1267_v16 = vpop.xlane.xlu0 %1266  ;;  %v1697_v23 = vadd.f32 %v2914_v32, %v1627_v48  ;;  %v1559_v47 = vmul.f32 %v1945_v17, %v2718_v33  ;;  %1954 = vrsqrt.f32 %v1438_v29  ;;  %v1376_v20 = vmul.f32 0.125, %v1270_v54 }
 0x228   : > { %1762 = vst.msk [vmem:[%s2922_s10 + $0x100] sm:$0xff] %vm756_vm0, %v1698_v39  ;;  %v1630_v59 = vmul.f32 %v2908_v2, %v1560_v22  ;;  %1956 = vrsqrt.f32 %v1437_v57  ;;  %v1375_v35 = vmul.f32 0.125, %v1267_v16 }
 0x229   : > { %v1947_v7 = vpop.eup %1946  ;;  %1761 = vst.msk [vmem:[%s2922_s10 + $0xf8] sm:$0xff] %vm756_vm0, %v1697_v23  ;;  %v1629_v58 = vmul.f32 %v2908_v2, %v1559_v47  ;;  %v1440_v28 = vadd.f32 1e-06, %v1376_v20  ;;  %v3316_v20 = vld [vmem:[#allocation16_spill] sm:$0xff] }
 0x22a   : > { %v1949_v49 = vpop.eup %1948  ;;  %v1700_v50 = vadd.f32 %v2914_v32, %v1630_v59  ;;  %v1562_v33 = vmul.f32 %v1947_v7, %v2734_v5  ;;  %v1439_v38 = vadd.f32 1e-06, %v1375_v35  ;;  %v1276_v56 = vpop.xlane.xlu1 %1275 }
 0x22b   : > { %v1273_v11 = vpop.xlane.xlu0 %1272  ;;  %v1699_v52 = vadd.f32 %v2914_v32, %v1629_v58  ;;  %v1561_v26 = vmul.f32 %v1949_v49, %v2730_v44  ;;  %1958 = vrsqrt.f32 %v1440_v28  ;;  %v1378_v9 = vmul.f32 0.125, %v1276_v56 }
 0x22c   : > { %1764 = vst.msk [vmem:[%s2922_s10 + $0x110] sm:$0xff] %vm756_vm0, %v1700_v50  ;;  %v1632_v62 = vmul.f32 %v2908_v2, %v1562_v33  ;;  %1960 = vrsqrt.f32 %v1439_v38  ;;  %v1377_v61 = vmul.f32 0.125, %v1273_v11  ;;  %v3317_v38 = vld [vmem:[#allocation17_spill] sm:$0xff] }
 0x22d   : > { %v1951_v3 = vpop.eup %1950  ;;  %1763 = vst.msk [vmem:[%s2922_s10 + $0x108] sm:$0xff] %vm756_vm0, %v1699_v52  ;;  %v1631_v5 = vmul.f32 %v2908_v2, %v1561_v26  ;;  %v1442_v1 = vadd.f32 1e-06, %v1378_v9 }
 0x22e   : > { %v1953_v31 = vpop.eup %1952  ;;  %v1702_v43 = vadd.f32 %v2914_v32, %v1632_v62  ;;  %v1564_v44 = vmul.f32 %v1951_v3, %v2746_v21  ;;  %v1441_v0 = vadd.f32 1e-06, %v1377_v61  ;;  %v1282_v40 = vpop.xlane.xlu1 %1281  ;;  %v3318_v62 = vld [vmem:[#allocation2_spill] sm:$0xff] }
 0x22f   : > { %v1279_v10 = vpop.xlane.xlu0 %1278  ;;  %v1701_v4 = vadd.f32 %v2914_v32, %v1631_v5  ;;  %v1563_v63 = vmul.f32 %v1953_v31, %v2742_v55  ;;  %1962 = vrsqrt.f32 %v1442_v1  ;;  %v1380_v8 = vmul.f32 0.125, %v1282_v40 }
 0x230   : > { %1766 = vst.msk [vmem:[%s2922_s10 + $0x120] sm:$0xff] %vm756_vm0, %v1702_v43  ;;  %v1634_v37 = vmul.f32 %v2908_v2, %v1564_v44  ;;  %1964 = vrsqrt.f32 %v1441_v0  ;;  %v1379_v46 = vmul.f32 0.125, %v1279_v10 }
 0x231   : > { %v1955_v60 = vpop.eup %1954  ;;  %1765 = vst.msk [vmem:[%s2922_s10 + $0x118] sm:$0xff] %vm756_vm0, %v1701_v4  ;;  %v1633_v21 = vmul.f32 %v2908_v2, %v1563_v63  ;;  %v1444_v19 = vadd.f32 1e-06, %v1380_v8 }
 0x232   : > { %v1957_v12 = vpop.eup %1956  ;;  %v1704_v6 = vadd.f32 %v2914_v32, %v1634_v37  ;;  %v1566_v55 = vmul.f32 %v1955_v60, %v2758_v36  ;;  %v1443_v18 = vadd.f32 1e-06, %v1379_v46  ;;  %v1288_v27 = vpop.xlane.xlu1 %1287  ;;  %v3319_v46 = vld [vmem:[#allocation3_spill] sm:$0xff] }
 0x233   : > { %v1285_v24 = vpop.xlane.xlu0 %1284  ;;  %v1703_v51 = vadd.f32 %v2914_v32, %v1633_v21  ;;  %v1565_v30 = vmul.f32 %v1957_v12, %v3315_v13  ;;  %1966 = vrsqrt.f32 %v1444_v19  ;;  %v1382_v42 = vmul.f32 0.125, %v1288_v27 }
 0x234   : > { %1768 = vst.msk [vmem:[%s2922_s10 + $0x130] sm:$0xff] %vm756_vm0, %v1704_v6  ;;  %v1636_v15 = vmul.f32 %v2908_v2, %v1566_v55  ;;  %1968 = vrsqrt.f32 %v1443_v18  ;;  %v1381_v48 = vmul.f32 0.125, %v1285_v24 }
 0x235   : > { %v1959_v29 = vpop.eup %1958  ;;  %1767 = vst.msk [vmem:[%s2922_s10 + $0x128] sm:$0xff] %vm756_vm0, %v1703_v51  ;;  %v1635_v36 = vmul.f32 %v2908_v2, %v1565_v30  ;;  %v1446_v17 = vadd.f32 1e-06, %v1382_v42 }
 0x236   : > { %v1961_v39 = vpop.eup %1960  ;;  %v1706_v22 = vadd.f32 %v2914_v32, %v1636_v15  ;;  %v1568_v57 = vmul.f32 %v1959_v29, %v2770_v53  ;;  %v1445_v54 = vadd.f32 1e-06, %v1381_v48  ;;  %v1294_v16 = vpop.xlane.xlu1 %1293  ;;  %v3320_v15 = vld [vmem:[#allocation4_spill] sm:$0xff] }
 0x237   : > { %v1291_v23 = vpop.xlane.xlu0 %1290  ;;  %v1705_v47 = vadd.f32 %v2914_v32, %v1635_v36  ;;  %v1567_v59 = vmul.f32 %v1961_v39, %v3316_v20  ;;  %1970 = vrsqrt.f32 %v1446_v17  ;;  %v1384_v35 = vmul.f32 0.125, %v1294_v16  ;;  %v3321_v16 = vld [vmem:[#allocation6_spill] sm:$0xff] }
 0x238   : > { %1770 = vst.msk [vmem:[%s2922_s10 + $0x140] sm:$0xff] %vm756_vm0, %v1706_v22  ;;  %v1638_v7 = vmul.f32 %v2908_v2, %v1568_v57  ;;  %1972 = vrsqrt.f32 %v1445_v54  ;;  %v1383_v58 = vmul.f32 0.125, %v1291_v23 }
 0x239   : > { %v1963_v28 = vpop.eup %1962  ;;  %1769 = vst.msk [vmem:[%s2922_s10 + $0x138] sm:$0xff] %vm756_vm0, %v1705_v47  ;;  %v1637_v53 = vmul.f32 %v2908_v2, %v1567_v59  ;;  %v1448_v49 = vadd.f32 1e-06, %v1384_v35 }
 0x23a   : > { %v1965_v50 = vpop.eup %1964  ;;  %v1708_v33 = vadd.f32 %v2914_v32, %v1638_v7  ;;  %v1570_v56 = vmul.f32 %v1963_v28, %v3317_v38  ;;  %v1447_v11 = vadd.f32 1e-06, %v1383_v58  ;;  %v1300_v52 = vpop.xlane.xlu1 %1299  ;;  %v3322_v7 = vld [vmem:[#allocation5_spill] sm:$0xff] }
 0x23b   : > { %v1297_v26 = vpop.xlane.xlu0 %1296  ;;  %v1707_v9 = vadd.f32 %v2914_v32, %v1637_v53  ;;  %v1569_v61 = vmul.f32 %v1965_v50, %v3318_v62  ;;  %1974 = vrsqrt.f32 %v1448_v49  ;;  %v1386_v3 = vmul.f32 0.125, %v1300_v52 }
 0x23c   : > { %1772 = vst.msk [vmem:[%s2922_s10 + $0x150] sm:$0xff] %vm756_vm0, %v1708_v33  ;;  %v1640_v5 = vmul.f32 %v2908_v2, %v1570_v56  ;;  %1976 = vrsqrt.f32 %v1447_v11  ;;  %v1385_v1 = vmul.f32 0.125, %v1297_v26 }
 0x23d   : > { %v1967_v31 = vpop.eup %1966  ;;  %1771 = vst.msk [vmem:[%s2922_s10 + $0x148] sm:$0xff] %vm756_vm0, %v1707_v9  ;;  %v1639_v43 = vmul.f32 %v2908_v2, %v1569_v61  ;;  %v1450_v44 = vadd.f32 1e-06, %v1386_v3  ;;  %v3323_v3 = vld [vmem:[#allocation7_spill] sm:$0xff] }
 0x23e   : > { %v1969_v0 = vpop.eup %1968  ;;  %v1710_v40 = vadd.f32 %v2914_v32, %v1640_v5  ;;  %v1572_v10 = vmul.f32 %v1967_v31, %v2794_v34  ;;  %v1449_v4 = vadd.f32 1e-06, %v1385_v1  ;;  %v1306_v63 = vpop.xlane.xlu1 %1305 }
 0x23f   : > { %v1303_v8 = vpop.xlane.xlu0 %1302  ;;  %v1709_v37 = vadd.f32 %v2914_v32, %v1639_v43  ;;  %v1571_v60 = vmul.f32 %v1969_v0, %v3319_v46  ;;  %1978 = vrsqrt.f32 %v1450_v44  ;;  %v1388_v21 = vmul.f32 0.125, %v1306_v63 }
 0x240   : > { %1774 = vst.msk [vmem:[%s2922_s10 + $0x160] sm:$0xff] %vm756_vm0, %v1710_v40  ;;  %v1642_v19 = vmul.f32 %v2908_v2, %v1572_v10  ;;  %1980 = vrsqrt.f32 %v1449_v4  ;;  %v1387_v12 = vmul.f32 0.125, %v1303_v8 }
 0x241   : > { %v1971_v6 = vpop.eup %1970  ;;  %1773 = vst.msk [vmem:[%s2922_s10 + $0x158] sm:$0xff] %vm756_vm0, %v1709_v37  ;;  %v1641_v34 = vmul.f32 %v2908_v2, %v1571_v60  ;;  %v1452_v55 = vadd.f32 1e-06, %v1388_v21  ;;  %v3324_v60 = vld [vmem:[#allocation8_spill] sm:$0xff] }
 0x242   : > { %v1973_v18 = vpop.eup %1972  ;;  %v1712_v27 = vadd.f32 %v2914_v32, %v1642_v19  ;;  %v1574_v24 = vmul.f32 %v1971_v6, %v2806_v41  ;;  %v1451_v51 = vadd.f32 1e-06, %v1387_v12  ;;  %v1312_v13 = vpop.xlane.xlu1 %1311 }
 0x243   : > { %v1309_v30 = vpop.xlane.xlu0 %1308  ;;  %v1711_v42 = vadd.f32 %v2914_v32, %v1641_v34  ;;  %v1573_v48 = vmul.f32 %v1973_v18, %v3320_v15  ;;  %1982 = vrsqrt.f32 %v1452_v55  ;;  %v1390_v29 = vmul.f32 0.125, %v1312_v13 }
 0x244   : > { %1776 = vst.msk [vmem:[%s2922_s10 + $0x170] sm:$0xff] %vm756_vm0, %v1712_v27  ;;  %v1644_v36 = vmul.f32 %v2908_v2, %v1574_v24  ;;  %1984 = vrsqrt.f32 %v1451_v51  ;;  %v1389_v17 = vmul.f32 0.125, %v1309_v30 }
 0x245   : > { %v1975_v39 = vpop.eup %1974  ;;  %1775 = vst.msk [vmem:[%s2922_s10 + $0x168] sm:$0xff] %vm756_vm0, %v1711_v42  ;;  %v1643_v41 = vmul.f32 %v2908_v2, %v1573_v48  ;;  %v1454_v22 = vadd.f32 1e-06, %v1390_v29  ;;  %v3325_v42 = vld [vmem:[#allocation9_spill] sm:$0xff] }
 0x246   : > { %v1977_v57 = vpop.eup %1976  ;;  %v1714_v54 = vadd.f32 %v2914_v32, %v1644_v36  ;;  %v1576_v23 = vmul.f32 %v1975_v39, %v3321_v16  ;;  %v1453_v47 = vadd.f32 1e-06, %v1389_v17  ;;  %v1318_v20 = vpop.xlane.xlu1 %1317  ;;  %v3327_v16 = vld [vmem:[#allocation10_spill] sm:$0xff] }
 0x247   : > { %v1315_v59 = vpop.xlane.xlu0 %1314  ;;  %v1713_v35 = vadd.f32 %v2914_v32, %v1643_v41  ;;  %v1575_v58 = vmul.f32 %v1977_v57, %v3322_v7  ;;  %1986 = vrsqrt.f32 %v1454_v22  ;;  %v1392_v28 = vmul.f32 0.125, %v1318_v20  ;;  %v2005_v41 = vld [vmem:[%s3238_s4] ss:$0 sm:$0xff]  ;;  %v3326_v57 = vld [vmem:[#allocation11_spill] sm:$0xff] }
 0x248   : > { %1778 = vst.msk [vmem:[%s2922_s10 + $0x180] sm:$0xff] %vm756_vm0, %v1714_v54  ;;  %v1646_v53 = vmul.f32 %v2908_v2, %v1576_v23  ;;  %1988 = vrsqrt.f32 %v1453_v47  ;;  %v1391_v49 = vmul.f32 0.125, %v1315_v59 }
 0x249   : > { %v1979_v50 = vpop.eup %1978  ;;  %1777 = vst.msk [vmem:[%s2922_s10 + $0x178] sm:$0xff] %vm756_vm0, %v1713_v35  ;;  %v1645_v33 = vmul.f32 %v2908_v2, %v1575_v58  ;;  %v1456_v38 = vadd.f32 1e-06, %v1392_v28  ;;  %v3328_v58 = vld [vmem:[#allocation19_spill] sm:$0xff] }
 0x24a   : > { %v1981_v56 = vpop.eup %1980  ;;  %v1716_v11 = vadd.f32 %v2914_v32, %v1646_v53  ;;  %v1578_v52 = vmul.f32 %v1979_v50, %v2830_v45  ;;  %v1455_v26 = vadd.f32 1e-06, %v1391_v49  ;;  %v1324_v9 = vpop.xlane.xlu1 %1323  ;;  %v3329_v49 = vld [vmem:[#allocation18_spill] sm:$0xff] }
 0x24b   : > { %v1321_v62 = vpop.xlane.xlu0 %1320  ;;  %v1715_v61 = vadd.f32 %v2914_v32, %v1645_v33  ;;  %v1577_v5 = vmul.f32 %v1981_v56, %v3323_v3  ;;  %1990 = vrsqrt.f32 %v1456_v38  ;;  %v1394_v1 = vmul.f32 0.125, %v1324_v9 }
 0x24c   : > { %1780 = vst.msk [vmem:[%s2922_s10 + $0x190] sm:$0xff] %vm756_vm0, %v1716_v11  ;;  %v1648_v31 = vmul.f32 %v2908_v2, %v1578_v52  ;;  %1992 = vrsqrt.f32 %v1455_v26  ;;  %v1393_v43 = vmul.f32 0.125, %v1321_v62  ;;  %v3330_v26 = vld [vmem:[#allocation20_spill] sm:$0xff] }
 0x24d   : > { %v1983_v44 = vpop.eup %1982  ;;  %1779 = vst.msk [vmem:[%s2922_s10 + $0x188] sm:$0xff] %vm756_vm0, %v1715_v61  ;;  %v1647_v45 = vmul.f32 %v2908_v2, %v1577_v5  ;;  %v1458_v0 = vadd.f32 1e-06, %v1394_v1  ;;  %v3331_v61 = vld [vmem:[#allocation12_spill] sm:$0xff] }
 0x24e   : > { %v1985_v40 = vpop.eup %1984  ;;  %v1718_v10 = vadd.f32 %v2914_v32, %v1648_v31  ;;  %v1580_v4 = vmul.f32 %v1983_v44, %v2842_v25  ;;  %v1457_v63 = vadd.f32 1e-06, %v1393_v43  ;;  %v1330_v8 = vpop.xlane.xlu1 %1329  ;;  %v3332_v44 = vld [vmem:[#allocation13_spill] sm:$0xff] }
 0x24f   : > { %v1327_v37 = vpop.xlane.xlu0 %1326  ;;  %v1717_v46 = vadd.f32 %v2914_v32, %v1647_v45  ;;  %v1579_v21 = vmul.f32 %v1985_v40, %v3324_v60  ;;  %1994 = vrsqrt.f32 %v1458_v0  ;;  %v1396_v19 = vmul.f32 0.125, %v1330_v8 }
 0x250   : > { %1782 = vst.msk [vmem:[%s2922_s10 + $0x1a0] sm:$0xff] %vm756_vm0, %v1718_v10  ;;  %v1650_v12 = vmul.f32 %v2908_v2, %v1580_v4  ;;  %1996 = vrsqrt.f32 %v1457_v63  ;;  %v1395_v6 = vmul.f32 0.125, %v1327_v37 }
 0x251   : > { %v1987_v34 = vpop.eup %1986  ;;  %1781 = vst.msk [vmem:[%s2922_s10 + $0x198] sm:$0xff] %vm756_vm0, %v1717_v46  ;;  %v1649_v25 = vmul.f32 %v2908_v2, %v1579_v21  ;;  %v1460_v55 = vadd.f32 1e-06, %v1396_v19 }
 0x252   : > { %v1989_v18 = vpop.eup %1988  ;;  %v1720_v27 = vadd.f32 %v2914_v32, %v1650_v12  ;;  %v1582_v24 = vmul.f32 %v1987_v34, %v2854_v14  ;;  %v1459_v51 = vadd.f32 1e-06, %v1395_v6  ;;  %v2004_v14 = vld [vmem:[%s3237_s3] ss:$0 sm:$0xff] }
 0x253   : > { %v1333_v13 = vpop.xlane.xlu0 %1332  ;;  %v1719_v30 = vadd.f32 %v2914_v32, %v1649_v25  ;;  %v1581_v15 = vmul.f32 %v1989_v18, %v3325_v42  ;;  %1998 = vrsqrt.f32 %v1460_v55 }
 0x254   : > { %v1397_v48 = vmul.f32 0.125, %v1333_v13  ;;  %1784 = vst.msk [vmem:[%s2922_s10 + $0x1b0] sm:$0xff] %vm756_vm0, %v1720_v27  ;;  %v1652_v29 = vmul.f32 %v2908_v2, %v1582_v24  ;;  %2000 = vrsqrt.f32 %v1459_v51 }
 0x255   : > { %v1991_v36 = vpop.eup %1990  ;;  %1783 = vst.msk [vmem:[%s2922_s10 + $0x1a8] sm:$0xff] %vm756_vm0, %v1719_v30  ;;  %v1651_v17 = vmul.f32 %v2004_v14, %v1581_v15 }
 0x256   : > { %v1461_v32 = vadd.f32 1e-06, %v1397_v48  ;;  %v1993_v39 = vpop.eup %1992  ;;  %v1722_v22 = vadd.f32 %v2005_v41, %v1652_v29  ;;  %v1584_v2 = vmul.f32 %v1991_v36, %v3326_v57 }
 0x257   : > { %v1721_v54 = vadd.f32 %v2005_v41, %v1651_v17  ;;  %v1583_v23 = vmul.f32 %v1993_v39, %v3327_v16 }
 0x258   : > { %2002 = vrsqrt.f32 %v1461_v32  ;;  %1786 = vst.msk [vmem:[%s2922_s10 + $0x1c0] sm:$0xff] %vm756_vm0, %v1722_v22  ;;  %v1654_v47 = vmul.f32 %v2004_v14, %v1584_v2 }
 0x259   : > { %v1995_v20 = vpop.eup %1994  ;;  %1785 = vst.msk [vmem:[%s2922_s10 + $0x1b8] sm:$0xff] %vm756_vm0, %v1721_v54  ;;  %v1653_v59 = vmul.f32 %v2004_v14, %v1583_v23 }
 0x25a   : > { %v1997_v35 = vpop.eup %1996  ;;  %v1724_v7 = vadd.f32 %v2005_v41, %v1654_v47  ;;  %v1586_v28 = vmul.f32 %v1995_v20, %v3328_v58 }
 0x25b   : > { %v1723_v53 = vadd.f32 %v2005_v41, %v1653_v59  ;;  %v1585_v50 = vmul.f32 %v1997_v35, %v3329_v49 }
 0x25c   : > { %1788 = vst.msk [vmem:[%s2922_s10 + $0x1d0] sm:$0xff] %vm756_vm0, %v1724_v7  ;;  %v1656_v33 = vmul.f32 %v2004_v14, %v1586_v28 }
 0x25d   : > { %v1999_v38 = vpop.eup %1998  ;;  %1787 = vst.msk [vmem:[%s2922_s10 + $0x1c8] sm:$0xff] %vm756_vm0, %v1723_v53  ;;  %v1655_v56 = vmul.f32 %v2004_v14, %v1585_v50 }
 0x25e   : > { %v2001_v11 = vpop.eup %2000  ;;  %v1726_v52 = vadd.f32 %v2005_v41, %v1656_v33  ;;  %v1588_v9 = vmul.f32 %v1999_v38, %v3330_v26 }
 0x25f   : > { %v1725_v62 = vadd.f32 %v2005_v41, %v1655_v56  ;;  %v1587_v3 = vmul.f32 %v2001_v11, %v3331_v61 }
 0x260   : > { %1790 = vst.msk [vmem:[%s2922_s10 + $0x1e0] sm:$0xff] %vm756_vm0, %v1726_v52  ;;  %v1658_v5 = vmul.f32 %v2004_v14, %v1588_v9 }
 0x261   : > { %1789 = vst.msk [vmem:[%s2922_s10 + $0x1d8] sm:$0xff] %vm756_vm0, %v1725_v62  ;;  %v1657_v31 = vmul.f32 %v2004_v14, %v1587_v3 }
 0x262   : > { %v2003_v1 = vpop.eup %2002  ;;  %v1728_v43 = vadd.f32 %v2005_v41, %v1658_v5 }
 0x263   : > { %v1589_v45 = vmul.f32 %v2003_v1, %v3332_v44  ;;  %v1727_v0 = vadd.f32 %v2005_v41, %v1657_v31 }
 0x264   : > { %1792 = vst.msk [vmem:[%s2922_s10 + $0x1f0] sm:$0xff] %vm756_vm0, %v1728_v43 }
 0x265   : > { %v1659_v40 = vmul.f32 %v2004_v14, %v1589_v45  ;;  %1791 = vst.msk [vmem:[%s2922_s10 + $0x1e8] sm:$0xff] %vm756_vm0, %v1727_v0 }
 0x267   : > { %v1729_v10 = vadd.f32 %v2005_v41, %v1659_v40 }
 0x269   : > { %1793 = vst.msk [vmem:[%s2922_s10 + $0x1f8] sm:$0xff] %vm756_vm0, %v1729_v10 }
 0x26a PF: > { %s15_s18 = sadd.s32 1, %s2012_s18  }
 0x26b   : > { %p12_p4 = scmp.ge.s32.totalorder %s15_s18, 7  }
 0x26d   :  { %14 = sbr.rel (!%p12_p4) target bundleno = 1 (0x1), region = 70 }

</bundles_post_ra>
